<compile_context>
chip_gen: v6e
topology: v6e:2x2x1
jax: 0.10.0
libtpu: 0.0.40
codegen_flags: <defaults>
</compile_context>

<pallas_src>
import jax
import jax.numpy as jnp
import numpy as np
from jax.experimental import pallas as pl
from jax.experimental.pallas import tpu as pltpu


def _round_up(x, m):
    return (x + m - 1) // m * m


# ----------------------------------------------------------------------------
# Pallas kernel
# ----------------------------------------------------------------------------
def attn_decoder_kernel(
    emb_ref,    # (Np, Ep)      f32   embedded prev token (seq_len == 1)
    h0_ref,     # (Np, Hp)      f32   prev hidden state
    c0_ref,     # (Np, Hp)      f32   prev cell state
    enc_ref,    # (Np, L, Hp)   bf16  encoder hidden states
    wih_ref,    # (Ep, 4*Hp)    f32   LSTM input weights (gate-major, padded)
    whh_ref,    # (Hp, 4*Hp)    f32   LSTM hidden weights (gate-major, padded)
    b_ref,      # (1, 4*Hp)     f32   b_ih + b_hh (gate-major, padded)
    wfh_ref,    # (Hp, TILE_V)  bf16  fc-weight tile for the h_new half
    wfc_ref,    # (Hp, TILE_V)  bf16  fc-weight tile for the context half
    fcb_ref,    # (1, TILE_V)   f32   fc bias tile (-1e30 on padded vocab cols)
    out_ref,    # (Np, TILE_V)  f32   log-probabilities tile
    hn_ref,     # (Np, Hp)      f32   new hidden state
    cn_ref,     # (Np, Hp)      f32   new cell state
    h_s,        # VMEM (Np, Hp) f32   scratch: h_new
    c_s,        # VMEM (Np, Hp) f32   scratch: c_new
    ctx_s,      # VMEM (Np, Hp) f32   scratch: attention context
    m_s,        # VMEM (Np, 1)  f32   scratch: running max  (log-softmax)
    s_s,        # VMEM (Np, 1)  f32   scratch: running sum-exp
):
    p = pl.program_id(0)          # 0: stats pass, 1: normalize/write pass
    j = pl.program_id(1)          # vocab tile index
    nv = pl.num_programs(1)
    Hp = h0_ref.shape[1]

    # ---- once, at the very first grid step: LSTM cell + attention ----------
    @pl.when((p == 0) & (j == 0))
    def _():
        x = emb_ref[...]
        h_prev = h0_ref[...]
        c_prev = c0_ref[...]

        # Gate layout [i | f | g | o], each Hp lanes -> vreg-aligned slices.
        gates = (
            jnp.dot(x, wih_ref[...], preferred_element_type=jnp.float32)
            + jnp.dot(h_prev, whh_ref[...], preferred_element_type=jnp.float32)
            + b_ref[...]
        )
        i_g = jax.nn.sigmoid(gates[:, 0 * Hp:1 * Hp])
        f_g = jax.nn.sigmoid(gates[:, 1 * Hp:2 * Hp])
        g_g = jnp.tanh(gates[:, 2 * Hp:3 * Hp])
        o_g = jax.nn.sigmoid(gates[:, 3 * Hp:4 * Hp])

        c_new = f_g * c_prev + i_g * g_g
        h_new = o_g * jnp.tanh(c_new)          # == out (seq_len == 1)

        h_s[...] = h_new
        c_s[...] = c_new

        # Attention (no softmax on the scores — matches the reference module).
        enc = enc_ref[...].astype(jnp.float32)                       # (Np,L,Hp)
        scores = jnp.sum(enc * h_new[:, None, :], axis=2, keepdims=True)
        ctx_s[...] = jnp.sum(enc * scores, axis=1)                   # (Np, Hp)

        # Init running log-softmax stats.
        m_s[...] = jnp.full_like(m_s, -jnp.inf)
        s_s[...] = jnp.zeros_like(s_s)

    # ---- every grid step: one vocab tile of logits --------------------------
    # logits = [h_new, ctx] @ W_fc + b, with W_fc split in two halves so no
    # lane-dim concat is needed.  bf16 operands -> bf16 MXU path, f32 accum.
    h_bf = h_s[...].astype(jnp.bfloat16)
    c_bf = ctx_s[...].astype(jnp.bfloat16)
    logits = (
        jnp.dot(h_bf, wfh_ref[...], preferred_element_type=jnp.float32)
        + jnp.dot(c_bf, wfc_ref[...], preferred_element_type=jnp.float32)
        + fcb_ref[...]
    )

    @pl.when(p == 0)
    def _():
        # Pass 0: online max / sum-exp over the vocab tiles.
        m_prev = m_s[...]
        m_new = jnp.maximum(m_prev, jnp.max(logits, axis=1, keepdims=True))
        s_s[...] = (s_s[...] * jnp.exp(m_prev - m_new)
                    + jnp.sum(jnp.exp(logits - m_new), axis=1, keepdims=True))
        m_s[...] = m_new
        out_ref[...] = logits          # placeholder; overwritten in pass 1

    @pl.when(p == 1)
    def _():
        # Pass 1: normalize and write the final log-probabilities.
        lse = m_s[...] + jnp.log(s_s[...])
        out_ref[...] = logits - lse

    # ---- last grid step: write the recurrent state (lane-dense (Np, Hp)) ----
    @pl.when((p == 1) & (j == nv - 1))
    def _():
        hn_ref[...] = h_s[...]
        cn_ref[...] = c_s[...]


# ----------------------------------------------------------------------------
# One-time parameter preprocessing (hoisted out of the per-step path)
# ----------------------------------------------------------------------------
def preprocess_params(params, *, vocab_size, embedding_dim, hidden_size,
                      tile_v=512):
    V, E, H = vocab_size, embedding_dim, hidden_size
    Ep = _round_up(E, 128)
    Hp = _round_up(H, 128)
    TILE_V = min(tile_v, _round_up(V, 128))
    Vp = _round_up(V, TILE_V)

    # LSTM weights: transpose to (in, out) and split the 4H axis per gate so
    # each gate is independently zero-padded H -> Hp (keeps gate slices
    # vreg-aligned inside the kernel).
    def pad_lstm(w, in_dim, in_pad):
        w_t = w.T.reshape(in_dim, 4, H)                    # (in, gate, H)
        out = jnp.zeros((in_pad, 4, Hp), jnp.float32)
        out = out.at[:in_dim, :, :H].set(w_t)
        return out.reshape(in_pad, 4 * Hp)

    wih = pad_lstm(params["w_ih"], E, Ep)                  # (Ep, 4*Hp) f32
    whh = pad_lstm(params["w_hh"], H, Hp)                  # (Hp, 4*Hp) f32

    b = (params["b_ih"] + params["b_hh"]).reshape(4, H)
    b_p = jnp.zeros((4, Hp), jnp.float32).at[:, :H].set(b).reshape(1, 4 * Hp)

    # fc weight split into the h_new half and the context half (no concat),
    # stored bf16 (the dominant HBM operand), padded V -> Vp.
    w_h = params["fc_w"][:, :H].T                          # (H, V)
    w_c = params["fc_w"][:, H:].T                          # (H, V)
    wfh = jnp.zeros((Hp, Vp), jnp.float32).at[:H, :V].set(w_h)
    wfc = jnp.zeros((Hp, Vp), jnp.float32).at[:H, :V].set(w_c)

    # Padded vocab columns get a -1e30 bias so exp() underflows to 0 and they
    # do not perturb the log-softmax normalization.
    fcb = jnp.full((1, Vp), -1e30, jnp.float32).at[0, :V].set(params["fc_b"])

    # Embedding table with pre-padded feature dim; rows gathered per step.
    emb_tbl = jnp.zeros((V, Ep), jnp.float32).at[:, :E].set(params["embedding"])

    return {
        "emb_tbl": emb_tbl,
        "wih": wih, "whh": whh, "b": b_p,
        "wfh": wfh.astype(jnp.bfloat16), "wfc": wfc.astype(jnp.bfloat16),
        "fcb": fcb,
        "dims": dict(V=V, E=E, H=H, Vp=Vp, Ep=Ep, Hp=Hp, TILE_V=TILE_V),
    }


# ----------------------------------------------------------------------------
# Per-step forward wrapper (mirrors AttnDecoderRNN.forward)
# ----------------------------------------------------------------------------
def attn_decoder_forward(prev_outputs, prev_hn, prev_cn, encoder_hidden_states,
                         prep):
    d = prep["dims"]
    V, H = d["V"], d["H"]
    Vp, Ep, Hp, TILE_V = d["Vp"], d["Ep"], d["Hp"], d["TILE_V"]

    N = prev_outputs.shape[0]
    L = encoder_hidden_states.shape[1]
    Np = max(8, _round_up(N, 8))          # sublane-pad the batch

    # Per-step glue: embedding row gather + zero padding to TPU tile sizes.
    # TODO(synk): fuse the gather into the kernel with
    # PrefetchScalarGridSpec(num_scalar_prefetch=1) + a pl.Element row spec,
    # and alias h0/c0 -> hn/cn with input_output_aliases in a real decode loop.
    emb = jnp.zeros((Np, Ep), jnp.float32)
    emb = emb.at[:N].set(prep["emb_tbl"][prev_outputs[:, 0]])
    h0 = jnp.zeros((Np, Hp), jnp.float32).at[:N, :H].set(prev_hn[0])
    c0 = jnp.zeros((Np, Hp), jnp.float32).at[:N, :H].set(prev_cn[0])
    enc = jnp.zeros((Np, L, Hp), jnp.float32).at[:N, :, :H].set(
        encoder_hidden_states).astype(jnp.bfloat16)

    n_v = Vp // TILE_V
    grid = (2, n_v)                       # (pass, vocab tile), both sequential

    const2 = lambda p, j: (0, 0)
    const3 = lambda p, j: (0, 0, 0)
    vtile = lambda p, j: (0, j)

    log_probs, hn, cn = pl.pallas_call(
        attn_decoder_kernel,
        grid=grid,
        in_specs=[
            pl.BlockSpec((Np, Ep), const2),          # emb
            pl.BlockSpec((Np, Hp), const2),          # h0
            pl.BlockSpec((Np, Hp), const2),          # c0
            pl.BlockSpec((Np, L, Hp), const3),       # enc (bf16)
            pl.BlockSpec((Ep, 4 * Hp), const2),      # wih
            pl.BlockSpec((Hp, 4 * Hp), const2),      # whh
            pl.BlockSpec((1, 4 * Hp), const2),       # fused LSTM bias
            pl.BlockSpec((Hp, TILE_V), vtile),       # W_fc(h half), streamed
            pl.BlockSpec((Hp, TILE_V), vtile),       # W_fc(ctx half), streamed
            pl.BlockSpec((1, TILE_V), vtile),        # fc bias, streamed
        ],
        out_specs=(
            pl.BlockSpec((Np, TILE_V), vtile),       # log-probs (streamed)
            pl.BlockSpec((Np, Hp), const2),          # hn (resident)
            pl.BlockSpec((Np, Hp), const2),          # cn (resident)
        ),
        out_shape=(
            jax.ShapeDtypeStruct((Np, Vp), jnp.float32),
            jax.ShapeDtypeStruct((Np, Hp), jnp.float32),
            jax.ShapeDtypeStruct((Np, Hp), jnp.float32),
        ),
        scratch_shapes=[
            pltpu.VMEM((Np, Hp), jnp.float32),       # h_new
            pltpu.VMEM((Np, Hp), jnp.float32),       # c_new
            pltpu.VMEM((Np, Hp), jnp.float32),       # context
            pltpu.VMEM((Np, 1), jnp.float32),        # running max
            pltpu.VMEM((Np, 1), jnp.float32),        # running sum-exp
        ],
        compiler_params=pltpu.CompilerParams(
            dimension_semantics=("arbitrary", "arbitrary"),
            vmem_limit_bytes=32 * 1024 * 1024,
        ),
    )(emb, h0, c0, enc, prep["wih"], prep["whh"], prep["b"],
      prep["wfh"], prep["wfc"], prep["fcb"])

    # Un-pad back to the PyTorch output shapes.
    return log_probs[:N, :V], hn[None, :N, :H], cn[None, :N, :H]


# ----------------------------------------------------------------------------
# Pure-JAX reference (mirrors the kernel's bf16 storage points), for checking
# ----------------------------------------------------------------------------
def reference_forward(prev_outputs, prev_hn, prev_cn, enc, params):
    hi = jax.lax.Precision.HIGHEST
    H = prev_hn.shape[-1]

    emb = params["embedding"][prev_outputs[:, 0]]
    h0, c0 = prev_hn[0], prev_cn[0]
    gates = (jnp.dot(emb, params["w_ih"].T, precision=hi)
             + jnp.dot(h0, params["w_hh"].T, precision=hi)
             + params["b_ih"] + params["b_hh"])
    i_g = jax.nn.sigmoid(gates[:, 0 * H:1 * H])
    f_g = jax.nn.sigmoid(gates[:, 1 * H:2 * H])
    g_g = jnp.tanh(gates[:, 2 * H:3 * H])
    o_g = jax.nn.sigmoid(gates[:, 3 * H:4 * H])
    c_new = f_g * c0 + i_g * g_g
    h_new = o_g * jnp.tanh(c_new)

    enc_q = enc.astype(jnp.bfloat16).astype(jnp.float32)
    scores = jnp.sum(enc_q * h_new[:, None, :], axis=2, keepdims=True)
    ctx = jnp.sum(enc_q * scores, axis=1)

    wfh = params["fc_w"][:, :H].astype(jnp.bfloat16).astype(jnp.float32)
    wfc = params["fc_w"][:, H:].astype(jnp.bfloat16).astype(jnp.float32)
    h_q = h_new.astype(jnp.bfloat16).astype(jnp.float32)
    c_q = ctx.astype(jnp.bfloat16).astype(jnp.float32)
    logits = (jnp.dot(h_q, wfh.T, precision=hi)
              + jnp.dot(c_q, wfc.T, precision=hi) + params["fc_b"])
    log_probs = jax.nn.log_softmax(logits, axis=1)
    return log_probs, h_new[None], c_new[None]


# ----------------------------------------------------------------------------
# Deterministic parameter init (shapes from AttnDecoderRNN.__init__)
# ----------------------------------------------------------------------------
def init_params(key, vocab_size, embedding_dim, hidden_size):
    ks = jax.random.split(key, 7)
    inv_h = 1.0 / jnp.sqrt(hidden_size)
    inv_2h = 1.0 / jnp.sqrt(2.0 * hidden_size)

    embedding = jax.random.normal(ks[0], (vocab_size, embedding_dim),
                                  jnp.float32)
    embedding = embedding.at[0].set(0.0)  # padding_idx = 0

    return {
        "embedding": embedding,
        "w_ih": jax.random.uniform(ks[1], (4 * hidden_size, embedding_dim),
                                   jnp.float32, -inv_h, inv_h),
        "w_hh": jax.random.uniform(ks[2], (4 * hidden_size, hidden_size),
                                   jnp.float32, -inv_h, inv_h),
        "b_ih": jax.random.uniform(ks[3], (4 * hidden_size,),
                                   jnp.float32, -inv_h, inv_h),
        "b_hh": jax.random.uniform(ks[4], (4 * hidden_size,),
                                   jnp.float32, -inv_h, inv_h),
        "fc_w": jax.random.uniform(ks[5], (vocab_size, 2 * hidden_size),
                                   jnp.float32, -inv_2h, inv_2h),
        "fc_b": jax.random.uniform(ks[6], (vocab_size,),
                                   jnp.float32, -inv_2h, inv_2h),
    }


if __name__ == "__main__":
    N = 2            # batch
    L = 8            # input_seq_len
    V = 64           # vocab_size
    E = 16           # embedding_dim
    H = 32           # hidden_size

    key = jax.random.PRNGKey(0)
    k_tok, k_h, k_c, k_enc, k_params = jax.random.split(key, 5)

    prev_outputs = jax.random.randint(k_tok, (N, 1), 0, V, dtype=jnp.int32)
    prev_hn = jax.random.normal(k_h, (1, N, H), jnp.float32)
    prev_cn = jax.random.normal(k_c, (1, N, H), jnp.float32)
    encoder_hidden_states = jax.random.normal(k_enc, (N, L, H), jnp.float32)

    params = init_params(k_params, V, E, H)
    prep = preprocess_params(params, vocab_size=V, embedding_dim=E,
                             hidden_size=H)

    log_probs, hn, cn = attn_decoder_forward(
        prev_outputs, prev_hn, prev_cn, encoder_hidden_states, prep)
    jax.block_until_ready((log_probs, hn, cn))

    assert log_probs.shape == (N, V)
    assert hn.shape == (1, N, H)
    assert cn.shape == (1, N, H)

    # Correctness check against a pure-JAX reference (loose tolerance on the
    # log-probs to absorb the bf16 weight/activation storage of the fc path).
    ref_lp, ref_hn, ref_cn = reference_forward(
        prev_outputs, prev_hn, prev_cn, encoder_hidden_states, params)
    np.testing.assert_allclose(np.asarray(hn), np.asarray(ref_hn),
                               rtol=2e-2, atol=2e-2)
    np.testing.assert_allclose(np.asarray(cn), np.asarray(ref_cn),
                               rtol=2e-2, atol=2e-2)
    np.testing.assert_allclose(np.asarray(log_probs), np.asarray(ref_lp),
                               rtol=1e-1, atol=1e-1)
    # log-softmax must be properly normalized over the *real* vocab columns.
    assert np.allclose(np.exp(np.asarray(log_probs)).sum(axis=1), 1.0,
                       atol=1e-3)

    print("KERNEL_OK")
</pallas_src>

<mosaic_0001>
module attributes {stable_mosaic.version = 11 : i64} {
  func.func @attn_decoder_kernel(%arg0: i32, %arg1: i32, %arg2: memref<8x128xf32, #tpu.memory_space<vmem>>, %arg3: memref<8x128xf32, #tpu.memory_space<vmem>>, %arg4: memref<8x128xf32, #tpu.memory_space<vmem>>, %arg5: memref<8x8x128xbf16, #tpu.memory_space<vmem>>, %arg6: memref<128x512xf32, #tpu.memory_space<vmem>>, %arg7: memref<128x512xf32, #tpu.memory_space<vmem>>, %arg8: memref<1x512xf32, #tpu.memory_space<vmem>>, %arg9: memref<128x128xbf16, #tpu.memory_space<vmem>>, %arg10: memref<128x128xbf16, #tpu.memory_space<vmem>>, %arg11: memref<1x128xf32, #tpu.memory_space<vmem>>, %arg12: memref<8x128xf32, #tpu.memory_space<vmem>>, %arg13: memref<8x128xf32, #tpu.memory_space<vmem>>, %arg14: memref<8x128xf32, #tpu.memory_space<vmem>>, %arg15: memref<8x128xf32, #tpu.memory_space<vmem>>, %arg16: memref<8x128xf32, #tpu.memory_space<vmem>>, %arg17: memref<8x128xf32, #tpu.memory_space<vmem>>, %arg18: memref<8x1xf32, #tpu.memory_space<vmem>>, %arg19: memref<8x1xf32, #tpu.memory_space<vmem>>) attributes {dimension_semantics = [#tpu.dimension_semantics<arbitrary>, #tpu.dimension_semantics<arbitrary>], iteration_bounds = array<i64: 2, 1>, scalar_prefetch = 0 : i64, scratch_operands = 5 : i64, tpu.core_type = #tpu.core_type<tc>, window_params = [{pipeline_mode = #tpu.pipeline_mode<synchronous>, transform_indices = @transform_0, window_bounds = array<i64: 8, 128>}, {pipeline_mode = #tpu.pipeline_mode<synchronous>, transform_indices = @transform_1, window_bounds = array<i64: 8, 128>}, {pipeline_mode = #tpu.pipeline_mode<synchronous>, transform_indices = @transform_2, window_bounds = array<i64: 8, 128>}, {pipeline_mode = #tpu.pipeline_mode<synchronous>, transform_indices = @transform_3, window_bounds = array<i64: 8, 8, 128>}, {pipeline_mode = #tpu.pipeline_mode<synchronous>, transform_indices = @transform_4, window_bounds = array<i64: 128, 512>}, {pipeline_mode = #tpu.pipeline_mode<synchronous>, transform_indices = @transform_5, window_bounds = array<i64: 128, 512>}, {pipeline_mode = #tpu.pipeline_mode<synchronous>, transform_indices = @transform_6, window_bounds = array<i64: 1, 512>}, {transform_indices = @transform_7, window_bounds = array<i64: 128, 128>}, {transform_indices = @transform_8, window_bounds = array<i64: 128, 128>}, {transform_indices = @transform_9, window_bounds = array<i64: 1, 128>}, {transform_indices = @transform_10, window_bounds = array<i64: 8, 128>}, {pipeline_mode = #tpu.pipeline_mode<synchronous>, transform_indices = @transform_11, window_bounds = array<i64: 8, 128>}, {pipeline_mode = #tpu.pipeline_mode<synchronous>, transform_indices = @transform_12, window_bounds = array<i64: 8, 128>}]} {
    %c0_i32 = arith.constant 0 : i32
    %0 = arith.cmpi eq, %arg0, %c0_i32 : i32
    %c0_i32_0 = arith.constant 0 : i32
    %1 = arith.cmpi eq, %arg1, %c0_i32_0 : i32
    %2 = arith.andi %0, %1 : i1
    %3 = arith.extui %2 : i1 to i32
    %c0_i32_1 = arith.constant 0 : i32
    %4 = arith.cmpi ne, %3, %c0_i32_1 : i32
    scf.if %4 {
      %c0_18 = arith.constant 0 : index
      %c0_19 = arith.constant 0 : index
      %28 = vector.load %arg2[%c0_18, %c0_19] : memref<8x128xf32, #tpu.memory_space<vmem>>, vector<8x128xf32>
      %c0_20 = arith.constant 0 : index
      %c0_21 = arith.constant 0 : index
      %29 = vector.load %arg3[%c0_20, %c0_21] : memref<8x128xf32, #tpu.memory_space<vmem>>, vector<8x128xf32>
      %c0_22 = arith.constant 0 : index
      %c0_23 = arith.constant 0 : index
      %30 = vector.load %arg4[%c0_22, %c0_23] : memref<8x128xf32, #tpu.memory_space<vmem>>, vector<8x128xf32>
      %c0_24 = arith.constant 0 : index
      %c0_25 = arith.constant 0 : index
      %31 = vector.load %arg6[%c0_24, %c0_25] : memref<128x512xf32, #tpu.memory_space<vmem>>, vector<128x512xf32>
      %cst_26 = arith.constant dense<0.000000e+00> : vector<8x512xf32>
      %32 = tpu.matmul %28, %31, %cst_26 {dimension_numbers = #tpu.dot_dimension_numbers<[1], [0], [0], [1], [0, 0, 1, 1], [], []>} : vector<8x128xf32>, vector<128x512xf32>, vector<8x512xf32> -> vector<8x512xf32>
      %c0_27 = arith.constant 0 : index
      %c0_28 = arith.constant 0 : index
      %33 = vector.load %arg7[%c0_27, %c0_28] : memref<128x512xf32, #tpu.memory_space<vmem>>, vector<128x512xf32>
      %cst_29 = arith.constant dense<0.000000e+00> : vector<8x512xf32>
      %34 = tpu.matmul %29, %33, %cst_29 {dimension_numbers = #tpu.dot_dimension_numbers<[1], [0], [0], [1], [0, 0, 1, 1], [], []>} : vector<8x128xf32>, vector<128x512xf32>, vector<8x512xf32> -> vector<8x512xf32>
      %35 = arith.addf %32, %34 : vector<8x512xf32>
      %c0_30 = arith.constant 0 : index
      %c0_31 = arith.constant 0 : index
      %36 = vector.load %arg8[%c0_30, %c0_31] : memref<1x512xf32, #tpu.memory_space<vmem>>, vector<1x512xf32>
      %37 = vector.broadcast %36 : vector<1x512xf32> to vector<8x512xf32>
      %38 = arith.addf %35, %37 : vector<8x512xf32>
      %39 = vector.extract_strided_slice %38 {offsets = [0, 0], sizes = [8, 128], strides = [1, 1]} : vector<8x512xf32> to vector<8x128xf32>
      %40 = arith.negf %39 : vector<8x128xf32>
      %41 = math.exp %40 : vector<8x128xf32>
      %cst_32 = arith.constant 1.000000e+00 : f32
      %42 = vector.broadcast %cst_32 : f32 to vector<8x128xf32>
      %43 = arith.addf %42, %41 : vector<8x128xf32>
      %44 = arith.divf %42, %43 : vector<8x128xf32>
      %45 = vector.extract_strided_slice %38 {offsets = [0, 128], sizes = [8, 128], strides = [1, 1]} : vector<8x512xf32> to vector<8x128xf32>
      %46 = arith.negf %45 : vector<8x128xf32>
      %47 = math.exp %46 : vector<8x128xf32>
      %cst_33 = arith.constant 1.000000e+00 : f32
      %48 = vector.broadcast %cst_33 : f32 to vector<8x128xf32>
      %49 = arith.addf %48, %47 : vector<8x128xf32>
      %50 = arith.divf %48, %49 : vector<8x128xf32>
      %51 = vector.extract_strided_slice %38 {offsets = [0, 256], sizes = [8, 128], strides = [1, 1]} : vector<8x512xf32> to vector<8x128xf32>
      %52 = math.tanh %51 : vector<8x128xf32>
      %53 = vector.extract_strided_slice %38 {offsets = [0, 384], sizes = [8, 128], strides = [1, 1]} : vector<8x512xf32> to vector<8x128xf32>
      %54 = arith.negf %53 : vector<8x128xf32>
      %55 = math.exp %54 : vector<8x128xf32>
      %cst_34 = arith.constant 1.000000e+00 : f32
      %56 = vector.broadcast %cst_34 : f32 to vector<8x128xf32>
      %57 = arith.addf %56, %55 : vector<8x128xf32>
      %58 = arith.divf %56, %57 : vector<8x128xf32>
      %59 = arith.mulf %50, %30 : vector<8x128xf32>
      %60 = arith.mulf %44, %52 : vector<8x128xf32>
      %61 = arith.addf %59, %60 : vector<8x128xf32>
      %62 = math.tanh %61 : vector<8x128xf32>
      %63 = arith.mulf %58, %62 : vector<8x128xf32>
      %c0_35 = arith.constant 0 : index
      %c0_36 = arith.constant 0 : index
      %64 = vector.load %arg15[%c0_35, %c0_36] : memref<8x128xf32, #tpu.memory_space<vmem>>, vector<8x128xf32>
      tpu.vector_store %arg15[%c0_35, %c0_36], %63 {strides = array<i32>} : memref<8x128xf32, #tpu.memory_space<vmem>>, vector<8x128xf32>,
      %c0_37 = arith.constant 0 : index
      %c0_38 = arith.constant 0 : index
      %65 = vector.load %arg16[%c0_37, %c0_38] : memref<8x128xf32, #tpu.memory_space<vmem>>, vector<8x128xf32>
      tpu.vector_store %arg16[%c0_37, %c0_38], %61 {strides = array<i32>} : memref<8x128xf32, #tpu.memory_space<vmem>>, vector<8x128xf32>,
      %c0_39 = arith.constant 0 : index
      %c0_40 = arith.constant 0 : index
      %c0_41 = arith.constant 0 : index
      %66 = vector.load %arg5[%c0_39, %c0_40, %c0_41] : memref<8x8x128xbf16, #tpu.memory_space<vmem>>, vector<8x8x128xbf16>
      %67 = arith.extf %66 : vector<8x8x128xbf16> to vector<8x8x128xf32>
      %68 = vector.shape_cast %63 : vector<8x128xf32> to vector<8x1x128xf32>
      %69 = vector.broadcast %68 : vector<8x1x128xf32> to vector<8x8x128xf32>
      %70 = arith.mulf %67, %69 : vector<8x8x128xf32>
      %cst_42 = arith.constant dense<0.000000e+00> : vector<8x8xf32>
      %71 = vector.multi_reduction <add>, %70, %cst_42 [2] : vector<8x8x128xf32> to vector<8x8xf32>
      %72 = vector.shape_cast %71 : vector<8x8xf32> to vector<8x8x1xf32>
      %73 = vector.broadcast %72 : vector<8x8x1xf32> to vector<8x8x128xf32>
      %74 = arith.mulf %67, %73 : vector<8x8x128xf32>
      %cst_43 = arith.constant dense<0.000000e+00> : vector<8x128xf32>
      %75 = vector.multi_reduction <add>, %74, %cst_43 [1] : vector<8x8x128xf32> to vector<8x128xf32>
      %c0_44 = arith.constant 0 : index
      %c0_45 = arith.constant 0 : index
      %76 = vector.load %arg17[%c0_44, %c0_45] : memref<8x128xf32, #tpu.memory_space<vmem>>, vector<8x128xf32>
      tpu.vector_store %arg17[%c0_44, %c0_45], %75 {strides = array<i32>} : memref<8x128xf32, #tpu.memory_space<vmem>>, vector<8x128xf32>,
      %cst_46 = arith.constant 0xFF800000 : f32
      %77 = vector.broadcast %cst_46 : f32 to vector<8x1xf32>
      %c0_47 = arith.constant 0 : index
      %c0_48 = arith.constant 0 : index
      %78 = vector.load %arg18[%c0_47, %c0_48] : memref<8x1xf32, #tpu.memory_space<vmem>>, vector<8x1xf32>
      tpu.vector_store %arg18[%c0_47, %c0_48], %77 {strides = array<i32>} : memref<8x1xf32, #tpu.memory_space<vmem>>, vector<8x1xf32>,
      %cst_49 = arith.constant 0.000000e+00 : f32
      %79 = vector.broadcast %cst_49 : f32 to vector<8x1xf32>
      %c0_50 = arith.constant 0 : index
      %c0_51 = arith.constant 0 : index
      %80 = vector.load %arg19[%c0_50, %c0_51] : memref<8x1xf32, #tpu.memory_space<vmem>>, vector<8x1xf32>
      tpu.vector_store %arg19[%c0_50, %c0_51], %79 {strides = array<i32>} : memref<8x1xf32, #tpu.memory_space<vmem>>, vector<8x1xf32>,
    } else {
    }
    %c0 = arith.constant 0 : index
    %c0_2 = arith.constant 0 : index
    %5 = vector.load %arg15[%c0, %c0_2] : memref<8x128xf32, #tpu.memory_space<vmem>>, vector<8x128xf32>
    %6 = arith.truncf %5 : vector<8x128xf32> to vector<8x128xbf16>
    %c0_3 = arith.constant 0 : index
    %c0_4 = arith.constant 0 : index
    %7 = vector.load %arg17[%c0_3, %c0_4] : memref<8x128xf32, #tpu.memory_space<vmem>>, vector<8x128xf32>
    %8 = arith.truncf %7 : vector<8x128xf32> to vector<8x128xbf16>
    %c0_5 = arith.constant 0 : index
    %c0_6 = arith.constant 0 : index
    %9 = vector.load %arg9[%c0_5, %c0_6] : memref<128x128xbf16, #tpu.memory_space<vmem>>, vector<128x128xbf16>
    %cst = arith.constant dense<0.000000e+00> : vector<8x128xf32>
    %10 = tpu.matmul %6, %9, %cst {dimension_numbers = #tpu.dot_dimension_numbers<[1], [0], [0], [1], [0, 0, 1, 1], [], []>} : vector<8x128xbf16>, vector<128x128xbf16>, vector<8x128xf32> -> vector<8x128xf32>
    %c0_7 = arith.constant 0 : index
    %c0_8 = arith.constant 0 : index
    %11 = vector.load %arg10[%c0_7, %c0_8] : memref<128x128xbf16, #tpu.memory_space<vmem>>, vector<128x128xbf16>
    %cst_9 = arith.constant dense<0.000000e+00> : vector<8x128xf32>
    %12 = tpu.matmul %8, %11, %cst_9 {dimension_numbers = #tpu.dot_dimension_numbers<[1], [0], [0], [1], [0, 0, 1, 1], [], []>} : vector<8x128xbf16>, vector<128x128xbf16>, vector<8x128xf32> -> vector<8x128xf32>
    %13 = arith.addf %10, %12 : vector<8x128xf32>
    %c0_10 = arith.constant 0 : index
    %c0_11 = arith.constant 0 : index
    %14 = vector.load %arg11[%c0_10, %c0_11] : memref<1x128xf32, #tpu.memory_space<vmem>>, vector<1x128xf32>
    %15 = vector.broadcast %14 : vector<1x128xf32> to vector<8x128xf32>
    %16 = arith.addf %13, %15 : vector<8x128xf32>
    %c0_i32_12 = arith.constant 0 : i32
    %17 = arith.cmpi eq, %arg0, %c0_i32_12 : i32
    %18 = arith.extui %17 : i1 to i32
    %c0_i32_13 = arith.constant 0 : i32
    %19 = arith.cmpi ne, %18, %c0_i32_13 : i32
    scf.if %19 {
      %c0_18 = arith.constant 0 : index
      %c0_19 = arith.constant 0 : index
      %28 = vector.load %arg18[%c0_18, %c0_19] : memref<8x1xf32, #tpu.memory_space<vmem>>, vector<8x1xf32>
      %cst_20 = arith.constant dense<0xFF800000> : vector<8xf32>
      %29 = vector.multi_reduction <maximumf>, %16, %cst_20 [1] : vector<8x128xf32> to vector<8xf32>
      %30 = vector.shape_cast %29 : vector<8xf32> to vector<8x1xf32>
      %31 = arith.maximumf %28, %30 : vector<8x1xf32>
      %c0_21 = arith.constant 0 : index
      %c0_22 = arith.constant 0 : index
      %32 = vector.load %arg19[%c0_21, %c0_22] : memref<8x1xf32, #tpu.memory_space<vmem>>, vector<8x1xf32>
      %33 = arith.subf %28, %31 : vector<8x1xf32>
      %34 = math.exp %33 : vector<8x1xf32>
      %35 = arith.mulf %32, %34 : vector<8x1xf32>
      %36 = vector.broadcast %31 : vector<8x1xf32> to vector<8x128xf32>
      %37 = arith.subf %16, %36 : vector<8x128xf32>
      %38 = math.exp %37 : vector<8x128xf32>
      %cst_23 = arith.constant dense<0.000000e+00> : vector<8xf32>
      %39 = vector.multi_reduction <add>, %38, %cst_23 [1] : vector<8x128xf32> to vector<8xf32>
      %40 = vector.shape_cast %39 : vector<8xf32> to vector<8x1xf32>
      %41 = arith.addf %35, %40 : vector<8x1xf32>
      %c0_24 = arith.constant 0 : index
      %c0_25 = arith.constant 0 : index
      %42 = vector.load %arg19[%c0_24, %c0_25] : memref<8x1xf32, #tpu.memory_space<vmem>>, vector<8x1xf32>
      tpu.vector_store %arg19[%c0_24, %c0_25], %41 {strides = array<i32>} : memref<8x1xf32, #tpu.memory_space<vmem>>, vector<8x1xf32>,
      %c0_26 = arith.constant 0 : index
      %c0_27 = arith.constant 0 : index
      %43 = vector.load %arg18[%c0_26, %c0_27] : memref<8x1xf32, #tpu.memory_space<vmem>>, vector<8x1xf32>
      tpu.vector_store %arg18[%c0_26, %c0_27], %31 {strides = array<i32>} : memref<8x1xf32, #tpu.memory_space<vmem>>, vector<8x1xf32>,
      %c0_28 = arith.constant 0 : index
      %c0_29 = arith.constant 0 : index
      %44 = vector.load %arg12[%c0_28, %c0_29] : memref<8x128xf32, #tpu.memory_space<vmem>>, vector<8x128xf32>
      tpu.vector_store %arg12[%c0_28, %c0_29], %16 {strides = array<i32>} : memref<8x128xf32, #tpu.memory_space<vmem>>, vector<8x128xf32>,
    } else {
    }
    %c1_i32 = arith.constant 1 : i32
    %20 = arith.cmpi eq, %arg0, %c1_i32 : i32
    %21 = arith.extui %20 : i1 to i32
    %c0_i32_14 = arith.constant 0 : i32
    %22 = arith.cmpi ne, %21, %c0_i32_14 : i32
    scf.if %22 {
      %c0_18 = arith.constant 0 : index
      %c0_19 = arith.constant 0 : index
      %28 = vector.load %arg18[%c0_18, %c0_19] : memref<8x1xf32, #tpu.memory_space<vmem>>, vector<8x1xf32>
      %c0_20 = arith.constant 0 : index
      %c0_21 = arith.constant 0 : index
      %29 = vector.load %arg19[%c0_20, %c0_21] : memref<8x1xf32, #tpu.memory_space<vmem>>, vector<8x1xf32>
      %30 = math.log %29 : vector<8x1xf32>
      %31 = arith.addf %28, %30 : vector<8x1xf32>
      %32 = vector.broadcast %31 : vector<8x1xf32> to vector<8x128xf32>
      %33 = arith.subf %16, %32 : vector<8x128xf32>
      %c0_22 = arith.constant 0 : index
      %c0_23 = arith.constant 0 : index
      %34 = vector.load %arg12[%c0_22, %c0_23] : memref<8x128xf32, #tpu.memory_space<vmem>>, vector<8x128xf32>
      tpu.vector_store %arg12[%c0_22, %c0_23], %33 {strides = array<i32>} : memref<8x128xf32, #tpu.memory_space<vmem>>, vector<8x128xf32>,
    } else {
    }
    %c1_i32_15 = arith.constant 1 : i32
    %23 = arith.cmpi eq, %arg0, %c1_i32_15 : i32
    %c0_i32_16 = arith.constant 0 : i32
    %24 = arith.cmpi eq, %arg1, %c0_i32_16 : i32
    %25 = arith.andi %23, %24 : i1
    %26 = arith.extui %25 : i1 to i32
    %c0_i32_17 = arith.constant 0 : i32
    %27 = arith.cmpi ne, %26, %c0_i32_17 : i32
    scf.if %27 {
      %c0_18 = arith.constant 0 : index
      %c0_19 = arith.constant 0 : index
      %28 = vector.load %arg15[%c0_18, %c0_19] : memref<8x128xf32, #tpu.memory_space<vmem>>, vector<8x128xf32>
      %c0_20 = arith.constant 0 : index
      %c0_21 = arith.constant 0 : index
      %29 = vector.load %arg13[%c0_20, %c0_21] : memref<8x128xf32, #tpu.memory_space<vmem>>, vector<8x128xf32>
      tpu.vector_store %arg13[%c0_20, %c0_21], %28 {strides = array<i32>} : memref<8x128xf32, #tpu.memory_space<vmem>>, vector<8x128xf32>,
      %c0_22 = arith.constant 0 : index
      %c0_23 = arith.constant 0 : index
      %30 = vector.load %arg16[%c0_22, %c0_23] : memref<8x128xf32, #tpu.memory_space<vmem>>, vector<8x128xf32>
      %c0_24 = arith.constant 0 : index
      %c0_25 = arith.constant 0 : index
      %31 = vector.load %arg14[%c0_24, %c0_25] : memref<8x128xf32, #tpu.memory_space<vmem>>, vector<8x128xf32>
      tpu.vector_store %arg14[%c0_24, %c0_25], %30 {strides = array<i32>} : memref<8x128xf32, #tpu.memory_space<vmem>>, vector<8x128xf32>,
    } else {
    }
    return
  }
  func.func @transform_0(%arg0: i32, %arg1: i32) -> (i32, i32) {
    %c0_i32 = arith.constant 0 : i32
    %c0_i32_0 = arith.constant 0 : i32
    %c0_i32_1 = arith.constant 0 : i32
    return %c0_i32, %c0_i32_0 : i32, i32
  }
  func.func @transform_1(%arg0: i32, %arg1: i32) -> (i32, i32) {
    %c0_i32 = arith.constant 0 : i32
    %c0_i32_0 = arith.constant 0 : i32
    %c0_i32_1 = arith.constant 0 : i32
    return %c0_i32, %c0_i32_0 : i32, i32
  }
  func.func @transform_2(%arg0: i32, %arg1: i32) -> (i32, i32) {
    %c0_i32 = arith.constant 0 : i32
    %c0_i32_0 = arith.constant 0 : i32
    %c0_i32_1 = arith.constant 0 : i32
    return %c0_i32, %c0_i32_0 : i32, i32
  }
  func.func @transform_3(%arg0: i32, %arg1: i32) -> (i32, i32, i32) {
    %c0_i32 = arith.constant 0 : i32
    %c0_i32_0 = arith.constant 0 : i32
    %c0_i32_1 = arith.constant 0 : i32
    %c0_i32_2 = arith.constant 0 : i32
    return %c0_i32, %c0_i32_0, %c0_i32_1 : i32, i32, i32
  }
  func.func @transform_4(%arg0: i32, %arg1: i32) -> (i32, i32) {
    %c0_i32 = arith.constant 0 : i32
    %c0_i32_0 = arith.constant 0 : i32
    %c0_i32_1 = arith.constant 0 : i32
    return %c0_i32, %c0_i32_0 : i32, i32
  }
  func.func @transform_5(%arg0: i32, %arg1: i32) -> (i32, i32) {
    %c0_i32 = arith.constant 0 : i32
    %c0_i32_0 = arith.constant 0 : i32
    %c0_i32_1 = arith.constant 0 : i32
    return %c0_i32, %c0_i32_0 : i32, i32
  }
  func.func @transform_6(%arg0: i32, %arg1: i32) -> (i32, i32) {
    %c0_i32 = arith.constant 0 : i32
    %c0_i32_0 = arith.constant 0 : i32
    %c0_i32_1 = arith.constant 0 : i32
    return %c0_i32, %c0_i32_0 : i32, i32
  }
  func.func @transform_7(%arg0: i32, %arg1: i32) -> (i32, i32) {
    %c0_i32 = arith.constant 0 : i32
    %c0_i32_0 = arith.constant 0 : i32
    return %c0_i32, %arg1 : i32, i32
  }
  func.func @transform_8(%arg0: i32, %arg1: i32) -> (i32, i32) {
    %c0_i32 = arith.constant 0 : i32
    %c0_i32_0 = arith.constant 0 : i32
    return %c0_i32, %arg1 : i32, i32
  }
  func.func @transform_9(%arg0: i32, %arg1: i32) -> (i32, i32) {
    %c0_i32 = arith.constant 0 : i32
    %c0_i32_0 = arith.constant 0 : i32
    return %c0_i32, %arg1 : i32, i32
  }
  func.func @transform_10(%arg0: i32, %arg1: i32) -> (i32, i32) {
    %c0_i32 = arith.constant 0 : i32
    %c0_i32_0 = arith.constant 0 : i32
    return %c0_i32, %arg1 : i32, i32
  }
  func.func @transform_11(%arg0: i32, %arg1: i32) -> (i32, i32) {
    %c0_i32 = arith.constant 0 : i32
    %c0_i32_0 = arith.constant 0 : i32
    %c0_i32_1 = arith.constant 0 : i32
    return %c0_i32, %c0_i32_0 : i32, i32
  }
  func.func @transform_12(%arg0: i32, %arg1: i32) -> (i32, i32) {
    %c0_i32 = arith.constant 0 : i32
    %c0_i32_0 = arith.constant 0 : i32
    %c0_i32_1 = arith.constant 0 : i32
    return %c0_i32, %c0_i32_0 : i32, i32
  }
}

</mosaic_0001>

<bundles_post_ra>
// kernel: tpu_custom_call.1
= control target key start
LH: loop header
LB: loop body
LE: loop exit
PB: predicated region body
PF: predicated region fallthrough
CT: control target
= control target key end

     0   :  { %s2624_s0 = inlined_call_operand.hbm [shape: f32[8,128], index: 0, kind: input, shape index: {}]   ;;  %s2625_s1 = inlined_call_operand.hbm [shape: f32[8,128], index: 1, kind: input, shape index: {}]   ;;  %s2626_s2 = inlined_call_operand.hbm [shape: f32[8,128], index: 2, kind: input, shape index: {}]   ;;  %s2627_s3 = inlined_call_operand.hbm [shape: bf16[8,8,128], index: 3, kind: input, shape index: {}]   ;;  %s2628_s4 = inlined_call_operand.hbm [shape: f32[128,512], index: 4, kind: input, shape index: {}]   ;;  %s2629_s5 = inlined_call_operand.hbm [shape: f32[128,512], index: 5, kind: input, shape index: {}]   ;;  %s2630_s6 = inlined_call_operand.vmem [shape: f32[1,512], index: 6, kind: input, shape index: {}]   ;;  %s2631_s7 = inlined_call_operand.hbm [shape: bf16[128,128], index: 7, kind: input, shape index: {}]   ;;  %s2632_s8 = inlined_call_operand.hbm [shape: bf16[128,128], index: 8, kind: input, shape index: {}]   ;;  %s2633_s9 = inlined_call_operand.vmem [shape: f32[1,128], index: 9, kind: input, shape index: {}]   ;;  %s2634_s10 = inlined_call_operand.hbm [shape: f32[8,128], index: 10, kind: output, shape index: {0}]   ;;  %s2635_s11 = inlined_call_operand.hbm [shape: f32[8,128], index: 11, kind: output, shape index: {1}]   ;;  %s2636_s12 = inlined_call_operand.hbm [shape: f32[8,128], index: 12, kind: output, shape index: {2}]  }
   0x1   :  { %2646 = sst [smem:[#allocation32_spill]] %s2624_s0 }
   0x2   :  { %18 = vsyncpa [#allocation8], 0 }
   0x3   :  { %19 = vsyncpa [#allocation11], 0 }
   0x4   :  { %20 = vsyncpa [#allocation14], 0 }
   0x5   :  { %21 = vsyncpa [#allocation17], 0 }
   0x6   :  { %22 = vsyncpa [#allocation20], 0 }
   0x7   :  { %23 = vsyncpa [#allocation9], 0 }
   0x8   :  { %24 = vsyncpa [#allocation23], 0  ;;  %s2402_s21 = smov 0   ;;  %s2404_s22 = smov 0  }
   0x9   :  { %s2406_s23 = smov 0  }
   0xa LB: > { %s2315_s24 = smov [#allocation10]   ;;  %s2637_s26 = sadd.s32 4294967295, %s2313_s23   ;;  %s2313_s23 = sphi %s2406_s23, %s30_s23   ;;  %s2309_s22 = sphi %s2404_s22, %s2660_s22   ;;  %s2305_s21 = sphi %s2402_s21, %s2659_s21  }
   0xb   : > { %s364_s25 = sshll.u32 %s2315_s24, 4  ;;  %p1676_p0 = scmp.ge.s32.totalorder %s2313_s23, 1  ;;  %s365_s25 = int_to_ptr.vmem [resolvable:$true] %s364_s25 }
   0xc   : > { %p340_p1 = scmp.lt.s32.totalorder %s2313_s23, 3  ;;  %p2422_p2 = scmp.eq.s32.totalorder %s2637_s26, 0 }
   0xd   : > { %s2316_s29 = smov [#allocation13]   ;;  %s2317_s14 = smov [#allocation16]  }
   0xe   : > { %s2647_s27 = scalar_select %p2422_p2, 1, 0 }
   0xf   : > { %p2426_p3 = pnand %p1676_p0, %p340_p1  ;;  %s385_s30 = sshll.u32 %s2316_s29, 4  ;;  %s2432_s30 = int_to_ptr.vmem [resolvable:$true] %s385_s30 }
  0x10   : > { %s411_s15 = sshll.u32 %s2317_s14, 4  ;;  %s1994_s17 = scalar_lea.vmem %s365_s25, 128  ;;  %s412_s15 = int_to_ptr.vmem [resolvable:$true] %s411_s15 }
  0x11   : > { %s2648_s28 = scalar_select %p2426_p3, 1, 0 }
  0x12   : > { %p1850_p4 = pneg %p2426_p3  ;;  %p1995_p7 = scmp.ne.s32.totalorder %s365_s25, %s1994_s17 }
  0x13   : > { %p2002_p10 = scmp.lt.s32.totalorder %s365_s25, %s365_s25  ;;  %p2003_p11 = scmp.lt.s32.totalorder %s1994_s17, %s1994_s17 }
  0x14   : > { %p2436_p5 = pnand %p2422_p2, %p1850_p4 }
  0x15   : > { %p2004_p12 = por %p2003_p11, %p2002_p10 }
  0x16   : > { %p2442_p6 = pneg %p2436_p5 }
  0x18   : > { %p1997_p8 = pnand %p1995_p7, %p2442_p6 }
  0x1a   : > { %p1998_p9 = pneg %p1997_p8 }
  0x1c   : > { %p2005_p13 = pnand %p2004_p12, %p1998_p9 }
  0x1e   : > { %2008 = shalt.err (!%p2005_p13)
}
  0x1f   : > { %1856 = dma.hbm_to_vmem [thread:$0]  (!%p2436_p5), %s2625_s1, 128, %s365_s25, [#allocation11]  }
  0x20   : > { %s2020_s20 = scalar_lea.vmem %s2432_s30, 512  ;;  %p2028_p7 = scmp.lt.s32.totalorder %s2432_s30, %s2432_s30 }
  0x21   : > { %p2021_p0 = scmp.ne.s32.totalorder %s2432_s30, %s2020_s20  ;;  %p2029_p8 = scmp.lt.s32.totalorder %s2020_s20, %s2020_s20 }
  0x23   : > { %p2023_p1 = pnand %p2021_p0, %p2442_p6  ;;  %p2030_p9 = por %p2029_p8, %p2028_p7 }
  0x25   : > { %p2024_p4 = pneg %p2023_p1 }
  0x27   : > { %p2031_p10 = pnand %p2030_p9, %p2024_p4 }
  0x29   : > { %2034 = shalt.err (!%p2031_p10)
}
  0x2a   : > { %s2638_s24 = smov 64   ;;  %s2640_s29 = smov 4  }
  0x2b   : > { %1862 = dma.hbm_to_vmem [thread:$0]  (!%p2436_p5), %s2627_s3, 512, %s2432_s30, [#allocation14], %s2638_s24, %s2638_s24, %s2640_s29  }
  0x2c   : > { %s2046_s17 = scalar_lea.vmem %s412_s15, 8192  ;;  %p2054_p0 = scmp.lt.s32.totalorder %s412_s15, %s412_s15 }
  0x2d   : > { %p2047_p11 = scmp.ne.s32.totalorder %s412_s15, %s2046_s17  ;;  %p2055_p1 = scmp.lt.s32.totalorder %s2046_s17, %s2046_s17 }
  0x2f   : > { %p2049_p12 = pnand %p2047_p11, %p2442_p6  ;;  %p2056_p4 = por %p2055_p1, %p2054_p0 }
  0x31   : > { %p2050_p13 = pneg %p2049_p12 }
  0x33   : > { %p2057_p7 = pnand %p2056_p4, %p2050_p13 }
  0x35   : > { %2060 = shalt.err (!%p2057_p7)
}
  0x36   : > { %s2642_s18 = smov 512   ;;  %s2321_s19 = smov 32  }
  0x37   : > { %1868 = dma.hbm_to_vmem [thread:$0]  (!%p2436_p5), %s2629_s5, 8192, %s412_s15, [#allocation17], %s2642_s18, %s2642_s18, %s2321_s19  }
  0x38   : > { %s42_s25 = sadd.s32 1, %s2309_s22  ;;  %s2322_s14 = smov [#allocation7]  }
  0x39   : > { %p44_p8 = scmp.ge.s32.totalorder %s42_s25, 2  ;;  %s353_s17 = sshll.u32 %s2322_s14, 4  ;;  %s354_s17 = int_to_ptr.vmem [resolvable:$true] %s353_s17 }
  0x3a   : > { %s2072_s26 = scalar_lea.vmem %s354_s17, 128  ;;  %p2080_p12 = scmp.lt.s32.totalorder %s354_s17, %s354_s17 }
  0x3b   : > { %s2662_s25 = smov (%p44_p8, %s42_s25), 0  ;;  %p2073_p9 = scmp.ne.s32.totalorder %s354_s17, %s2072_s26 }
  0x3c   : > { %p2081_p13 = scmp.lt.s32.totalorder %s2072_s26, %s2072_s26 }
  0x3d   : > { %p2075_p10 = pnand %p2073_p9, %p2442_p6 }
  0x3e   : > { %p2082_p0 = por %p2081_p13, %p2080_p12 }
  0x3f   : > { %p2076_p11 = pneg %p2075_p10 }
  0x41   : > { %p2083_p1 = pnand %p2082_p0, %p2076_p11 }
  0x43   : > { %2086 = shalt.err (!%p2083_p1)
}
  0x44   : > { %s2651_s0 = sld [smem:[#allocation32_spill]]  ;;  %s2323_s20 = smov [#allocation12]  }
  0x45   : > { %s375_s14 = sshll.u32 %s2323_s20, 4  ;;  %s2324_s24 = smov [#allocation15]   ;;  %s376_s14 = int_to_ptr.vmem [resolvable:$true] %s375_s14 }
  0x46   : > { %s398_s29 = sshll.u32 %s2324_s24, 4  ;;  %s2098_s18 = scalar_lea.vmem %s376_s14, 128  ;;  %s399_s29 = int_to_ptr.vmem [resolvable:$true] %s398_s29 }
  0x47   : > { %p2099_p4 = scmp.ne.s32.totalorder %s376_s14, %s2098_s18  ;;  %p2106_p9 = scmp.lt.s32.totalorder %s376_s14, %s376_s14 }
  0x48   : > { %p2107_p10 = scmp.lt.s32.totalorder %s2098_s18, %s2098_s18 }
  0x49   : > { %p2101_p7 = pnand %p2099_p4, %p2442_p6 }
  0x4a   : > { %1853 = dma.hbm_to_vmem [thread:$0]  (!%p2436_p5), %s2651_s0, 128, %s354_s17, [#allocation8]  }
  0x4b   : > { %p2102_p8 = pneg %p2101_p7  ;;  %p2108_p11 = por %p2107_p10, %p2106_p9 }
  0x4d   : > { %p2109_p12 = pnand %p2108_p11, %p2102_p8 }
  0x4f   : > { %2112 = shalt.err (!%p2109_p12)
}
  0x50   : > { %1859 = dma.hbm_to_vmem [thread:$0]  (!%p2436_p5), %s2626_s2, 128, %s376_s14, [#allocation11]  }
  0x51   : > { %s2124_s17 = scalar_lea.vmem %s399_s29, 8192  ;;  %p2132_p4 = scmp.lt.s32.totalorder %s399_s29, %s399_s29 }
  0x52   : > { %p2125_p13 = scmp.ne.s32.totalorder %s399_s29, %s2124_s17  ;;  %p2133_p7 = scmp.lt.s32.totalorder %s2124_s17, %s2124_s17 }
  0x54   : > { %p2127_p0 = pnand %p2125_p13, %p2442_p6  ;;  %p2134_p2 = por %p2133_p7, %p2132_p4 }
  0x56   : > { %p2128_p1 = pneg %p2127_p0 }
  0x58   : > { %p2135_p3 = pnand %p2134_p2, %p2128_p1 }
  0x5a   : > { %2138 = shalt.err (!%p2135_p3)
}
  0x5b   : > { %s2652_s24 = smov 512   ;;  %s2325_s20 = smov [#allocation18]  }
  0x5c   : > { %1865 = dma.hbm_to_vmem [thread:$0]  (!%p2436_p5), %s2628_s4, 8192, %s399_s29, [#allocation14], %s2652_s24, %s2652_s24, %s2321_s19  }
  0x5d   : > { %s429_s14 = sshll.u32 %s2325_s20, 4  ;;  %s2326_s26 = smov [#allocation19]   ;;  %s430_s14 = int_to_ptr.vmem [resolvable:$true] %s429_s14 }
  0x5e   : > { %s444_s15 = sshll.u32 %s2326_s26, 4  ;;  %s2150_s0 = scalar_lea.vmem %s430_s14, 1024  ;;  %s445_s15 = int_to_ptr.vmem [resolvable:$true] %s444_s15 }
  0x5f   : > { %p2151_p8 = scmp.ne.s32.totalorder %s430_s14, %s2150_s0  ;;  %p2158_p9 = scmp.lt.s32.totalorder %s430_s14, %s430_s14 }
  0x60   : > { %p2159_p10 = scmp.lt.s32.totalorder %s2150_s0, %s2150_s0 }
  0x61   : > { %p2153_p2 = pnand %p2151_p8, %p2442_p6 }
  0x62   : > { %p2160_p11 = por %p2159_p10, %p2158_p9 }
  0x63   : > { %p2154_p3 = pneg %p2153_p2 }
  0x65   : > { %p2161_p12 = pnand %p2160_p11, %p2154_p3 }
  0x67   : > { %2164 = shalt.err (!%p2161_p12)
}
  0x68   : > { %s2653_s17 = smov 4   ;;  %s2654_s18 = smov 64  }
  0x69   : > { %1871 = dma.hbm_to_vmem [thread:$0]  (!%p2436_p5), %s2631_s7, 1024, %s430_s14, [#allocation17], %s2654_s18, %s2654_s18, %s2653_s17  }
  0x6a   : > { %s2176_s24 = scalar_lea.vmem %s445_s15, 1024  ;;  %p2184_p4 = scmp.lt.s32.totalorder %s445_s15, %s445_s15 }
  0x6b   : > { %p2177_p13 = scmp.ne.s32.totalorder %s445_s15, %s2176_s24  ;;  %p2185_p7 = scmp.lt.s32.totalorder %s2176_s24, %s2176_s24 }
  0x6d   : > { %p2179_p0 = pnand %p2177_p13, %p2442_p6  ;;  %p2186_p8 = por %p2185_p7, %p2184_p4 }
  0x6f   : > { %p2180_p1 = pneg %p2179_p0 }
  0x71   : > { %p2187_p2 = pnand %p2186_p8, %p2180_p1 }
  0x73   : > { %2190 = shalt.err (!%p2187_p2)
}
  0x74   : > { %1874 = dma.hbm_to_vmem [thread:$0]  (!%p2436_p5), %s2632_s8, 1024, %s445_s15, [#allocation20], %s2654_s18, %s2654_s18, %s2653_s17  }
  0x75   : > { %p2655_p3 = scmp.ne.s32.totalorder %s2648_s28, 0 }
  0x76   : > { %p2656_p6 = scmp.ne.s32.totalorder (!%p2655_p3), %s2647_s27, 0 }
  0x77   : > { %466 = sbr.rel (%p2655_p3) target bundleno = 1484 (0x5cc), region = 60 }
  0x7c   : > { %2276 = dma.done.wait (%p2656_p6), [#allocation8], 128  }
  0x7d   : > { %2278 = vsyncadd (%p2656_p6), [#allocation8], 4294967168 }
  0x7e   : > { %2280 = dma.done.wait (%p2656_p6), [#allocation11], 256  }
  0x7f   : > { %2282 = vsyncadd (%p2656_p6), [#allocation11], 4294967040 }
  0x80   : > { %2284 = dma.done.wait (%p2656_p6), [#allocation14], 8704  }
  0x81   : > { %2286 = vsyncadd (%p2656_p6), [#allocation14], 4294958592 }
  0x82   : > { %2288 = dma.done.wait (%p2656_p6), [#allocation17], 9216  }
  0x83   : > { %2290 = vsyncadd (%p2656_p6), [#allocation17], 4294958080 }
  0x84   : > { %2292 = dma.done.wait (%p2656_p6), [#allocation20], 1024  }
  0x85   : > { %2294 = vsyncadd (%p2656_p6), [#allocation20], 4294966272  ;;  %p533_p5 = scmp.eq.s32.totalorder %s2305_s21, 0 }
  0x86   : > { %v667_v0 = vld [vmem:[#allocation16 + $0x1e8] sm:$0xff] (%p533_p5)  ;;  %v669_v1 = vld [vmem:[#allocation16 + $0x1f8] sm:$0xff] (%p533_p5)  ;;  %v666_v2 = vld [vmem:[#allocation16 + $0x1e0] sm:$0xff] (%p533_p5)  ;;  %vm1216_vm0 = vcmask (%p533_p5), 7168   ;;  %v2327_v6 = vmov (%p533_p5), -inf   ;;  %v2328_v7 = vmov (%p533_p5), 0.0  }
  0x87   : > { %538 = sbr.rel (!%p533_p5) target bundleno = 629 (0x275), region = 96  ;;  %670 = vmatprep.subr.mxu0 (%p533_p5), %v667_v0  ;;  %741 = vmatprep.subr.mxu1 (%p533_p5), %v669_v1  ;;  %v668_v3 = vld [vmem:[#allocation16 + $0x1f0] sm:$0xff] (%p533_p5)  ;;  %v663_v4 = vld [vmem:[#allocation16 + $0x1c8] sm:$0xff] (%p533_p5)  ;;  %v665_v5 = vld [vmem:[#allocation16 + $0x1d8] sm:$0xff] (%p533_p5)  ;;  %1217 = vst.msk [vmem:[#allocation5] sm:$0xff] (%p533_p5), %vm1216_vm0, %v2327_v6  ;;  %vm1200_vm1 = vcmask (%p533_p5), 1041409  }
  0x88   : > { %1218 = vst.msk [vmem:[#allocation6] sm:$0xff] (%p533_p5), %vm1216_vm0, %v2328_v7  ;;  %671 = vmatpush1.msra.mxu0 (%p533_p5), %v666_v2  ;;  %742 = vmatpush1.msra.mxu1 (%p533_p5), %v668_v3  ;;  %v662_v8 = vld [vmem:[#allocation16 + $0x1c0] sm:$0xff] (%p533_p5)  ;;  %v664_v9 = vld [vmem:[#allocation16 + $0x1d0] sm:$0xff] (%p533_p5)  ;;  %v659_v10 = vld [vmem:[#allocation16 + $0x1a8] sm:$0xff] (%p533_p5)  ;;  %vm1202_vm2 = vcmask (%p533_p5), 1042434   ;;  %vm1204_vm3 = vcmask (%p533_p5), 1043459  }
  0x89   : > { %672 = vmatprep.subr.mxu0 (%p533_p5), %v663_v4  ;;  %743 = vmatprep.subr.mxu1 (%p533_p5), %v665_v5  ;;  %v661_v11 = vld [vmem:[#allocation16 + $0x1b8] sm:$0xff] (%p533_p5)  ;;  %v658_v12 = vld [vmem:[#allocation16 + $0x1a0] sm:$0xff] (%p533_p5)  ;;  %v660_v13 = vld [vmem:[#allocation16 + $0x1b0] sm:$0xff] (%p533_p5)  ;;  %vm1206_vm4 = vcmask (%p533_p5), 1044484   ;;  %vm1208_vm5 = vcmask (%p533_p5), 1045509   ;;  %vm1210_vm6 = vcmask (%p533_p5), 1046534  }
  0x8a   : > { %673 = vmatpush1.msra.mxu0 (%p533_p5), %v662_v8  ;;  %744 = vmatpush1.msra.mxu1 (%p533_p5), %v664_v9  ;;  %v655_v14 = vld [vmem:[#allocation16 + $0x188] sm:$0xff] (%p533_p5)  ;;  %v657_v15 = vld [vmem:[#allocation16 + $0x198] sm:$0xff] (%p533_p5)  ;;  %v654_v16 = vld [vmem:[#allocation16 + $0x180] sm:$0xff] (%p533_p5)  ;;  %vm1212_vm7 = vcmask (%p533_p5), 1047559  }
  0x8b   : > { %674 = vmatprep.subr.mxu0 (%p533_p5), %v659_v10  ;;  %745 = vmatprep.subr.mxu1 (%p533_p5), %v661_v11  ;;  %v656_v17 = vld [vmem:[#allocation16 + $0x190] sm:$0xff] (%p533_p5)  ;;  %v651_v18 = vld [vmem:[#allocation16 + $0x168] sm:$0xff] (%p533_p5)  ;;  %v653_v19 = vld [vmem:[#allocation16 + $0x178] sm:$0xff] (%p533_p5) }
  0x8c   : > { %675 = vmatpush1.msra.mxu0 %v658_v12  ;;  %746 = vmatpush1.msra.mxu1 %v660_v13  ;;  %v650_v20 = vld [vmem:[#allocation16 + $0x160] sm:$0xff]  ;;  %v652_v21 = vld [vmem:[#allocation16 + $0x170] sm:$0xff]  ;;  %v647_v22 = vld [vmem:[#allocation16 + $0x148] sm:$0xff] }
  0x8d   : > { %676 = vmatprep.subr.mxu0 %v655_v14  ;;  %747 = vmatprep.subr.mxu1 %v657_v15  ;;  %v649_v23 = vld [vmem:[#allocation16 + $0x158] sm:$0xff]  ;;  %v646_v24 = vld [vmem:[#allocation16 + $0x140] sm:$0xff]  ;;  %v648_v25 = vld [vmem:[#allocation16 + $0x150] sm:$0xff] }
  0x8e   : > { %677 = vmatpush1.msra.mxu0 %v654_v16  ;;  %748 = vmatpush1.msra.mxu1 %v656_v17  ;;  %v643_v26 = vld [vmem:[#allocation16 + $0x128] sm:$0xff]  ;;  %v645_v27 = vld [vmem:[#allocation16 + $0x138] sm:$0xff]  ;;  %v642_v28 = vld [vmem:[#allocation16 + $0x120] sm:$0xff] }
  0x8f   : > { %678 = vmatprep.subr.mxu0 %v651_v18  ;;  %749 = vmatprep.subr.mxu1 %v653_v19  ;;  %v644_v29 = vld [vmem:[#allocation16 + $0x130] sm:$0xff]  ;;  %v639_v30 = vld [vmem:[#allocation16 + $0x108] sm:$0xff]  ;;  %v641_v31 = vld [vmem:[#allocation16 + $0x118] sm:$0xff] }
  0x90   : > { %679 = vmatpush1.msra.mxu0 %v650_v20  ;;  %750 = vmatpush1.msra.mxu1 %v652_v21  ;;  %v638_v32 = vld [vmem:[#allocation16 + $0x100] sm:$0xff]  ;;  %v640_v33 = vld [vmem:[#allocation16 + $0x110] sm:$0xff]  ;;  %v635_v34 = vld [vmem:[#allocation16 + $0xe8] sm:$0xff] }
  0x91   : > { %680 = vmatprep.subr.mxu0 %v647_v22  ;;  %751 = vmatprep.subr.mxu1 %v649_v23  ;;  %v637_v35 = vld [vmem:[#allocation16 + $0xf8] sm:$0xff]  ;;  %v634_v36 = vld [vmem:[#allocation16 + $0xe0] sm:$0xff]  ;;  %v636_v37 = vld [vmem:[#allocation16 + $0xf0] sm:$0xff] }
  0x92   : > { %681 = vmatpush1.msra.mxu0 %v646_v24  ;;  %752 = vmatpush1.msra.mxu1 %v648_v25  ;;  %v631_v38 = vld [vmem:[#allocation16 + $0xc8] sm:$0xff]  ;;  %v633_v39 = vld [vmem:[#allocation16 + $0xd8] sm:$0xff]  ;;  %v630_v40 = vld [vmem:[#allocation16 + $0xc0] sm:$0xff] }
  0x93   : > { %682 = vmatprep.subr.mxu0 %v643_v26  ;;  %753 = vmatprep.subr.mxu1 %v645_v27  ;;  %v632_v41 = vld [vmem:[#allocation16 + $0xd0] sm:$0xff]  ;;  %v627_v42 = vld [vmem:[#allocation16 + $0xa8] sm:$0xff]  ;;  %v629_v43 = vld [vmem:[#allocation16 + $0xb8] sm:$0xff] }
  0x94   : > { %683 = vmatpush1.msra.mxu0 %v642_v28  ;;  %754 = vmatpush1.msra.mxu1 %v644_v29  ;;  %v626_v44 = vld [vmem:[#allocation16 + $0xa0] sm:$0xff]  ;;  %v628_v45 = vld [vmem:[#allocation16 + $0xb0] sm:$0xff]  ;;  %v623_v46 = vld [vmem:[#allocation16 + $0x88] sm:$0xff] }
  0x95   : > { %684 = vmatprep.subr.mxu0 %v639_v30  ;;  %755 = vmatprep.subr.mxu1 %v641_v31  ;;  %v625_v47 = vld [vmem:[#allocation16 + $0x98] sm:$0xff]  ;;  %v622_v48 = vld [vmem:[#allocation16 + $0x80] sm:$0xff]  ;;  %v624_v49 = vld [vmem:[#allocation16 + $0x90] sm:$0xff] }
  0x96   : > { %685 = vmatpush1.msra.mxu0 %v638_v32  ;;  %756 = vmatpush1.msra.mxu1 %v640_v33  ;;  %v619_v50 = vld [vmem:[#allocation16 + $0x68] sm:$0xff]  ;;  %v621_v51 = vld [vmem:[#allocation16 + $0x78] sm:$0xff]  ;;  %v618_v52 = vld [vmem:[#allocation16 + $0x60] sm:$0xff] }
  0x97   : > { %686 = vmatprep.subr.mxu0 %v635_v34  ;;  %757 = vmatprep.subr.mxu1 %v637_v35  ;;  %v620_v53 = vld [vmem:[#allocation16 + $0x70] sm:$0xff]  ;;  %v615_v54 = vld [vmem:[#allocation16 + $0x48] sm:$0xff]  ;;  %v617_v55 = vld [vmem:[#allocation16 + $0x58] sm:$0xff] }
  0x98   : > { %687 = vmatpush1.msra.mxu0 %v634_v36  ;;  %758 = vmatpush1.msra.mxu1 %v636_v37  ;;  %v614_v56 = vld [vmem:[#allocation16 + $0x40] sm:$0xff]  ;;  %v616_v57 = vld [vmem:[#allocation16 + $0x50] sm:$0xff]  ;;  %v611_v58 = vld [vmem:[#allocation16 + $0x28] sm:$0xff] }
  0x99   : > { %688 = vmatprep.subr.mxu0 %v631_v38  ;;  %759 = vmatprep.subr.mxu1 %v633_v39  ;;  %v613_v59 = vld [vmem:[#allocation16 + $0x38] sm:$0xff]  ;;  %v610_v60 = vld [vmem:[#allocation16 + $0x20] sm:$0xff]  ;;  %v612_v61 = vld [vmem:[#allocation16 + $0x30] sm:$0xff] }
  0x9a   : > { %689 = vmatpush1.msra.mxu0 %v630_v40  ;;  %760 = vmatpush1.msra.mxu1 %v632_v41  ;;  %v607_v62 = vld [vmem:[#allocation16 + $0x8] sm:$0xff]  ;;  %v609_v63 = vld [vmem:[#allocation16 + $0x18] sm:$0xff]  ;;  %v606_v0 = vld [vmem:[#allocation16] sm:$0xff] }
  0x9b   : > { %690 = vmatprep.subr.mxu0 %v627_v42  ;;  %761 = vmatprep.subr.mxu1 %v629_v43  ;;  %v608_v1 = vld [vmem:[#allocation16 + $0x10] sm:$0xff]  ;;  %v603_v3 = vld [vmem:[#allocation15 + $0x1e8] sm:$0xff]  ;;  %v605_v4 = vld [vmem:[#allocation15 + $0x1f8] sm:$0xff] }
  0x9c   : > { %691 = vmatpush1.msra.mxu0 %v626_v44  ;;  %762 = vmatpush1.msra.mxu1 %v628_v45  ;;  %v540_v2 = vld [vmem:[#allocation10] sm:$0xff]  ;;  %v602_v5 = vld [vmem:[#allocation15 + $0x1e0] sm:$0xff]  ;;  %v599_v8 = vld [vmem:[#allocation15 + $0x1c8] sm:$0xff] }
  0x9d   : > { %692 = vmatprep.subr.mxu0 %v623_v46  ;;  %763 = vmatprep.subr.mxu1 %v625_v47  ;;  %v604_v6 = vld [vmem:[#allocation15 + $0x1f0] sm:$0xff]  ;;  %v601_v9 = vld [vmem:[#allocation15 + $0x1d8] sm:$0xff]  ;;  %v598_v10 = vld [vmem:[#allocation15 + $0x1c0] sm:$0xff] }
  0x9e   : > { %693 = vmatpush1.msra.mxu0 %v622_v48  ;;  %764 = vmatpush1.msra.mxu1 %v624_v49  ;;  %v600_v11 = vld [vmem:[#allocation15 + $0x1d0] sm:$0xff]  ;;  %v595_v12 = vld [vmem:[#allocation15 + $0x1a8] sm:$0xff]  ;;  %v597_v13 = vld [vmem:[#allocation15 + $0x1b8] sm:$0xff] }
  0x9f   : > { %694 = vmatprep.subr.mxu0 %v619_v50  ;;  %765 = vmatprep.subr.mxu1 %v621_v51  ;;  %v594_v14 = vld [vmem:[#allocation15 + $0x1a0] sm:$0xff]  ;;  %v596_v15 = vld [vmem:[#allocation15 + $0x1b0] sm:$0xff]  ;;  %v591_v16 = vld [vmem:[#allocation15 + $0x188] sm:$0xff] }
  0xa0   : > { %695 = vmatpush1.msra.mxu0 %v618_v52  ;;  %766 = vmatpush1.msra.mxu1 %v620_v53  ;;  %v593_v17 = vld [vmem:[#allocation15 + $0x198] sm:$0xff]  ;;  %v590_v18 = vld [vmem:[#allocation15 + $0x180] sm:$0xff]  ;;  %v592_v19 = vld [vmem:[#allocation15 + $0x190] sm:$0xff] }
  0xa1   : > { %696 = vmatprep.subr.mxu0 %v615_v54  ;;  %767 = vmatprep.subr.mxu1 %v617_v55  ;;  %v587_v20 = vld [vmem:[#allocation15 + $0x168] sm:$0xff]  ;;  %v589_v21 = vld [vmem:[#allocation15 + $0x178] sm:$0xff]  ;;  %v586_v22 = vld [vmem:[#allocation15 + $0x160] sm:$0xff] }
  0xa2   : > { %697 = vmatpush1.msra.mxu0 %v614_v56  ;;  %768 = vmatpush1.msra.mxu1 %v616_v57  ;;  %v588_v23 = vld [vmem:[#allocation15 + $0x170] sm:$0xff]  ;;  %v583_v24 = vld [vmem:[#allocation15 + $0x148] sm:$0xff]  ;;  %v585_v25 = vld [vmem:[#allocation15 + $0x158] sm:$0xff] }
  0xa3   : > { %698 = vmatprep.subr.mxu0 %v611_v58  ;;  %769 = vmatprep.subr.mxu1 %v613_v59  ;;  %v582_v26 = vld [vmem:[#allocation15 + $0x140] sm:$0xff]  ;;  %v584_v27 = vld [vmem:[#allocation15 + $0x150] sm:$0xff]  ;;  %v579_v28 = vld [vmem:[#allocation15 + $0x128] sm:$0xff] }
  0xa4   : > { %699 = vmatpush1.msra.mxu0 %v610_v60  ;;  %770 = vmatpush1.msra.mxu1 %v612_v61  ;;  %v581_v29 = vld [vmem:[#allocation15 + $0x138] sm:$0xff]  ;;  %v578_v30 = vld [vmem:[#allocation15 + $0x120] sm:$0xff]  ;;  %v580_v31 = vld [vmem:[#allocation15 + $0x130] sm:$0xff] }
  0xa5   : > { %700 = vmatprep.subr.mxu0 %v607_v62  ;;  %771 = vmatprep.subr.mxu1 %v609_v63  ;;  %v575_v32 = vld [vmem:[#allocation15 + $0x108] sm:$0xff]  ;;  %v577_v33 = vld [vmem:[#allocation15 + $0x118] sm:$0xff]  ;;  %v574_v34 = vld [vmem:[#allocation15 + $0x100] sm:$0xff] }
  0xa6   : > { %701 = vmatpush1.msra.mxu0 %v606_v0  ;;  %734 = vmatprep.mubr.f32.mxu0 %v2328_v7  ;;  %v576_v35 = vld [vmem:[#allocation15 + $0x110] sm:$0xff]  ;;  %v571_v36 = vld [vmem:[#allocation15 + $0xe8] sm:$0xff]  ;;  %v573_v37 = vld [vmem:[#allocation15 + $0xf8] sm:$0xff] }
  0xa7   : > { %772 = vmatpush1.msra.mxu1 %v608_v1  ;;  %735 = vmatmul.mubr.f32.vlgmr.msra.gmra.mxu0 %v540_v2  ;;  %v570_v38 = vld [vmem:[#allocation15 + $0xe0] sm:$0xff]  ;;  %v572_v39 = vld [vmem:[#allocation15 + $0xf0] sm:$0xff]  ;;  %v567_v40 = vld [vmem:[#allocation15 + $0xc8] sm:$0xff] }
  0xa8   : > { %805 = vmatprep.mubr.f32.mxu1 %v2328_v7  ;;  %812 = vmatprep.subr.mxu0 %v603_v3  ;;  %v569_v41 = vld [vmem:[#allocation15 + $0xd8] sm:$0xff]  ;;  %v566_v42 = vld [vmem:[#allocation15 + $0xc0] sm:$0xff]  ;;  %v568_v43 = vld [vmem:[#allocation15 + $0xd0] sm:$0xff] }
  0xa9   : > { %883 = vmatprep.subr.mxu1 %v605_v4  ;;  %806 = vmatmul.mubr.f32.vlgmr.msra.gmra.mxu1 %v540_v2  ;;  %v563_v44 = vld [vmem:[#allocation15 + $0xa8] sm:$0xff]  ;;  %v565_v45 = vld [vmem:[#allocation15 + $0xb8] sm:$0xff]  ;;  %v562_v46 = vld [vmem:[#allocation15 + $0xa0] sm:$0xff] }
  0xaa   : > { %813 = vmatpush1.msra.mxu0 %v602_v5  ;;  %884 = vmatpush1.msra.mxu1 %v604_v6  ;;  %v564_v47 = vld [vmem:[#allocation15 + $0xb0] sm:$0xff]  ;;  %v559_v48 = vld [vmem:[#allocation15 + $0x88] sm:$0xff]  ;;  %v561_v49 = vld [vmem:[#allocation15 + $0x98] sm:$0xff]  ;;  %v956_v5 = vlaneseq }
  0xab   : > { %814 = vmatprep.subr.mxu0 %v599_v8  ;;  %885 = vmatprep.subr.mxu1 %v601_v9  ;;  %v558_v50 = vld [vmem:[#allocation15 + $0x80] sm:$0xff]  ;;  %v560_v51 = vld [vmem:[#allocation15 + $0x90] sm:$0xff]  ;;  %v555_v52 = vld [vmem:[#allocation15 + $0x68] sm:$0xff] }
  0xac   : > { %815 = vmatpush1.msra.mxu0 %v598_v10  ;;  %886 = vmatpush1.msra.mxu1 %v600_v11  ;;  %v557_v53 = vld [vmem:[#allocation15 + $0x78] sm:$0xff]  ;;  %v554_v54 = vld [vmem:[#allocation15 + $0x60] sm:$0xff]  ;;  %v556_v55 = vld [vmem:[#allocation15 + $0x70] sm:$0xff]  ;;  %v957_v6 = vshrl.u32 %v956_v5, 7 }
  0xad   : > { %816 = vmatprep.subr.mxu0 %v595_v12  ;;  %887 = vmatprep.subr.mxu1 %v597_v13  ;;  %v551_v56 = vld [vmem:[#allocation15 + $0x48] sm:$0xff]  ;;  %v553_v57 = vld [vmem:[#allocation15 + $0x58] sm:$0xff]  ;;  %v550_v58 = vld [vmem:[#allocation15 + $0x40] sm:$0xff] }
  0xae   : > { %817 = vmatpush1.msra.mxu0 %v594_v14  ;;  %888 = vmatpush1.msra.mxu1 %v596_v15  ;;  %v552_v59 = vld [vmem:[#allocation15 + $0x50] sm:$0xff]  ;;  %v547_v60 = vld [vmem:[#allocation15 + $0x28] sm:$0xff]  ;;  %v549_v61 = vld [vmem:[#allocation15 + $0x38] sm:$0xff]  ;;  %v2553_v9 = vsub.s32 0, %v957_v6  ;;  %v962_v12 = vsub.s32 1, %v957_v6 }
  0xaf   : > { %818 = vmatprep.subr.mxu0 %v591_v16  ;;  %889 = vmatprep.subr.mxu1 %v593_v17  ;;  %v546_v62 = vld [vmem:[#allocation15 + $0x20] sm:$0xff]  ;;  %v548_v63 = vld [vmem:[#allocation15 + $0x30] sm:$0xff]  ;;  %v543_v0 = vld [vmem:[#allocation15 + $0x8] sm:$0xff] }
  0xb0   : > { %819 = vmatpush1.msra.mxu0 %v590_v18  ;;  %890 = vmatpush1.msra.mxu1 %v592_v19  ;;  %v545_v1 = vld [vmem:[#allocation15 + $0x18] sm:$0xff]  ;;  %v542_v2 = vld [vmem:[#allocation15] sm:$0xff]  ;;  %v544_v3 = vld [vmem:[#allocation15 + $0x10] sm:$0xff] }
  0xb1   : > { %820 = vmatprep.subr.mxu0 %v587_v20  ;;  %891 = vmatprep.subr.mxu1 %v589_v21  ;;  %v539_v4 = vld [vmem:[#allocation7] sm:$0xff]  ;;  %v954_v10 = vld [vmem:[%s2630_s6] sm:$0xf] }
  0xb2   : > { %821 = vmatpush1.msra.mxu0 %v586_v22  ;;  %892 = vmatpush1.msra.mxu1 %v588_v23  ;;  %v959_v14 = vrot.slane %v954_v10, %v2553_v9 }
  0xb3   : > { %822 = vmatprep.subr.mxu0 %v583_v24  ;;  %893 = vmatprep.subr.mxu1 %v585_v25  ;;  %v970_v24 = vsub.s32 3, %v957_v6 }
  0xb4   : > { %823 = vmatpush1.msra.mxu0 %v582_v26  ;;  %894 = vmatpush1.msra.mxu1 %v584_v27 }
  0xb5   : > { %824 = vmatprep.subr.mxu0 %v579_v28  ;;  %895 = vmatprep.subr.mxu1 %v581_v29  ;;  %v971_v28 = vrot.slane %v954_v10, %v970_v24  ;;  %v966_v29 = vsub.s32 2, %v957_v6 }
  0xb6   : > { %825 = vmatpush1.msra.mxu0 %v578_v30  ;;  %896 = vmatpush1.msra.mxu1 %v580_v31 }
  0xb7   : > { %826 = vmatprep.subr.mxu0 %v575_v32  ;;  %897 = vmatprep.subr.mxu1 %v577_v33  ;;  %v967_v32 = vrot.slane %v954_v10, %v966_v29 }
  0xb8   : > { %827 = vmatpush1.msra.mxu0 %v574_v34  ;;  %898 = vmatpush1.msra.mxu1 %v576_v35 }
  0xb9   : > { %828 = vmatprep.subr.mxu0 %v571_v36  ;;  %899 = vmatprep.subr.mxu1 %v573_v37 }
  0xba   : > { %829 = vmatpush1.msra.mxu0 %v570_v38  ;;  %900 = vmatpush1.msra.mxu1 %v572_v39 }
  0xbb   : > { %830 = vmatprep.subr.mxu0 %v567_v40  ;;  %901 = vmatprep.subr.mxu1 %v569_v41  ;;  %v541_v41 = vld [vmem:[#allocation12] sm:$0xff] }
  0xbc   : > { %831 = vmatpush1.msra.mxu0 %v566_v42  ;;  %902 = vmatpush1.msra.mxu1 %v568_v43 }
  0xbd   : > { %832 = vmatprep.subr.mxu0 %v563_v44  ;;  %903 = vmatprep.subr.mxu1 %v565_v45 }
  0xbe   : > { %833 = vmatpush1.msra.mxu0 %v562_v46  ;;  %904 = vmatpush1.msra.mxu1 %v564_v47 }
  0xbf   : > { %834 = vmatprep.subr.mxu0 %v559_v48  ;;  %905 = vmatprep.subr.mxu1 %v561_v49  ;;  %v2329_v48 = vmov 1966171168  }
  0xc0   : > { %835 = vmatpush1.msra.mxu0 %v558_v50  ;;  %906 = vmatpush1.msra.mxu1 %v560_v51  ;;  %v1025_v49 = vunpack.c.l.s4 %v2329_v48 }
  0xc1   : > { %836 = vmatprep.subr.mxu0 %v555_v52  ;;  %907 = vmatprep.subr.mxu1 %v557_v53 }
  0xc2   : > { %837 = vmatpush1.msra.mxu0 %v554_v54  ;;  %908 = vmatpush1.msra.mxu1 %v556_v55  ;;  %v1026_v50 = vunpack.c.0.s8 %v1025_v49  ;;  %v1730_v55 = vld [vmem:[#allocation13] sm:$0xff]  }
  0xc3   : > { %838 = vmatprep.subr.mxu0 %v551_v56  ;;  %909 = vmatprep.subr.mxu1 %v553_v57 }
  0xc4   : > { %839 = vmatpush1.msra.mxu0 %v550_v58  ;;  %910 = vmatpush1.msra.mxu1 %v552_v59  ;;  %v1029_v52 = vsub.s32 %v1026_v50, %v957_v6  ;;  %v1745_v58 = vld [vmem:[#allocation13 + $0x8] sm:$0xff]   ;;  %v1731_v59 = vunpack.c.l.bf16 %v1730_v55 }
  0xc5   : > { %840 = vmatprep.subr.mxu0 %v547_v60  ;;  %911 = vmatprep.subr.mxu1 %v549_v61 }
  0xc6   : > { %841 = vmatpush1.msra.mxu0 %v546_v62  ;;  %912 = vmatpush1.msra.mxu1 %v548_v63 }
  0xc7   : > { %842 = vmatprep.subr.mxu0 %v543_v0  ;;  %913 = vmatprep.subr.mxu1 %v545_v1  ;;  %v1735_v0 = vunpack.c.l.bf16 %v1745_v58 }
  0xc8   : > { %843 = vmatpush1.msra.mxu0 %v542_v2  ;;  %876 = vmatprep.mubr.f32.mxu0 %v2328_v7 }
  0xc9   : > { %914 = vmatpush1.msra.mxu1 %v544_v3  ;;  %947 = vmatprep.mubr.f32.mxu1 %v2328_v7  ;;  %v963_v7 = vrot.slane %v954_v10, %v962_v12  ;;  %v1732_v3 = vunpack.c.h.bf16 %v1730_v55  ;;  %v1746_v12 = vld [vmem:[#allocation13 + $0x10] sm:$0xff]  }
  0xca   : > { %877 = vmatmul.mubr.f32.vlgmr.msra.gmra.mxu0 %v539_v4  ;;  %948 = vmatmul.mubr.f32.vlgmr.msra.gmra.mxu1 %v539_v4 }
 0x167   : > { %v736_v8 = vpop.f32.mrf.mxu0 }
 0x169   : > { %v807_v11 = vpop.f32.mrf.mxu1  ;;  %v738_v13 = vpop.f32.mrf.mxu0 }
 0x16b   : > { %v809_v16 = vpop.f32.mrf.mxu1 }
 0x18a   : > { %v878_v15 = vpop.f32.mrf.mxu0  ;;  %v949_v20 = vpop.f32.mrf.mxu1 }
 0x18b   : > { %v879_v17 = vadd.f32 %v878_v15, %v736_v8  ;;  %v950_v31 = vadd.f32 %v949_v20, %v807_v11  ;;  %v1747_v20 = vld [vmem:[#allocation13 + $0x18] sm:$0xff]  }
 0x18c   : > { %v880_v18 = vpop.f32.mrf.mxu0  ;;  %v951_v26 = vpop.f32.mrf.mxu1  ;;  %v1744_v29 = vunpack.c.h.bf16 %v1747_v20 }
 0x18d   : > { %v976_v19 = vadd.f32 %v959_v14, %v879_v17  ;;  %v881_v21 = vadd.f32 %v880_v18, %v738_v13  ;;  %v952_v27 = vadd.f32 %v951_v26, %v809_v16  ;;  %v978_v35 = vadd.f32 %v967_v32, %v950_v31 }
 0x18e   : > { %v1736_v14 = vunpack.c.h.bf16 %v1745_v58  ;;  %v1743_v26 = vunpack.c.l.bf16 %v1747_v20 }
 0x18f   : > { %v1696_v22 = vmul.f32 -1.442695, %v976_v19  ;;  %v977_v23 = vadd.f32 %v963_v7, %v881_v21  ;;  %v979_v30 = vadd.f32 %v971_v28, %v952_v27  ;;  %v1739_v7 = vunpack.c.l.bf16 %v1746_v12 }
 0x191   : > { %1943 = vpow2.f32 %v1696_v22  ;;  %v1697_v25 = vmul.f32 -1.442695, %v977_v23  ;;  %v1698_v33 = vmul.f32 -1.442695, %v979_v30  ;;  %v1740_v22 = vunpack.c.h.bf16 %v1746_v12 }
 0x193   : > { %1945 = vpow2.f32 %v1697_v25 }
 0x194   : > { %1947 = vpow2.f32 %v1698_v33 }
 0x19e   : > { %v1944_v34 = vpop.eup %1943 }
 0x19f   : > { %v983_v36 = vadd.f32 1.0, %v1944_v34 }
 0x1a0   : > { %v1946_v37 = vpop.eup %1945 }
 0x1a1   : > { %1949 = vrcp.f32 %v983_v36  ;;  %v989_v38 = vadd.f32 1.0, %v1946_v37  ;;  %v1948_v39 = vpop.eup %1947 }
 0x1a2   : > { %1951 = vtanh.f32 %v978_v35  ;;  %v996_v44 = vadd.f32 1.0, %v1948_v39 }
 0x1a3   : > { %1953 = vrcp.f32 %v989_v38 }
 0x1a4   : > { %1955 = vrcp.f32 %v996_v44 }
 0x1ae   : > { %v1950_v40 = vpop.eup %1949 }
 0x1af   : > { %v1952_v42 = vpop.eup %1951 }
 0x1b0   : > { %v1954_v43 = vpop.eup %1953  ;;  %v1000_v45 = vmul.f32 %v1952_v42, %v1950_v40 }
 0x1b1   : > { %v999_v46 = vmul.f32 %v1954_v43, %v541_v41  ;;  %v1956_v51 = vpop.eup %1955 }
 0x1b3   : > { %v1001_v47 = vadd.f32 %v1000_v45, %v999_v46 }
 0x1b5   : > { %1005 = vst [vmem:[#allocation3] sm:$0xff] %v1001_v47  ;;  %1957 = vtanh.f32 %v1001_v47 }
 0x1c2   : > { %v1958_v53 = vpop.eup %1957 }
 0x1c3   : > { %v1003_v54 = vmul.f32 %v1958_v53, %v1956_v51 }
 0x1c5   : > { %v1030_v56 = vrot.slane %v1003_v54, %v1029_v52  ;;  %1004 = vst [vmem:[#allocation2] sm:$0xff] %v1003_v54  ;;  %v1023_v57 = vcombine.high %v1003_v54, %v1003_v54 }
 0x1c7   : > { %v1046_v60 = vrot.slane %v1030_v56, %v1029_v52  ;;  %v1038_v61 = vcombine.high %v1030_v56, %v1030_v56  ;;  %v1037_v62 = vrot.slane %v1023_v57, %v1029_v52 }
 0x1c9   : > { %v1075_v63 = vrot.slane %v1046_v60, %v2553_v9  ;;  %v1068_v1 = vcombine.high %v1046_v60, %v1046_v60  ;;  %v1060_v2 = vrot.slane %v1038_v61, %v1029_v52  ;;  %v1053_v4 = vrot.slane %v1037_v62, %v1029_v52 }
 0x1ca   : > { %v1039_v5 = vcombine.high %v1037_v62, %v1037_v62 }
 0x1cb   : > { %v1112_v6 = vmul.f32 %v1731_v59, %v1075_v63  ;;  %v1083_v8 = vrot.slane %v1068_v1, %v2553_v9  ;;  %v1079_v10 = vrot.slane %v1060_v2, %v2553_v9  ;;  %v1070_v11 = vcombine.high %v1060_v2, %v1060_v2 }
 0x1cc   : > { %v1067_v16 = vrot.slane %v1039_v5, %v1029_v52  ;;  %v1091_v18 = vrot.slane %v1053_v4, %v2553_v9  ;;  %v1069_v19 = vcombine.high %v1053_v4, %v1053_v4 }
 0x1cd   : > { %1120 = vadd.xlane.f32.xlu0 %v1112_v6  ;;  %v1114_v13 = vmul.f32 %v1735_v0, %v1083_v8  ;;  %v1087_v15 = vrot.slane %v1070_v11, %v2553_v9  ;;  %v1113_v17 = vmul.f32 %v1732_v3, %v1079_v10 }
 0x1ce   : > { %v1095_v23 = vrot.slane %v1067_v16, %v2553_v9  ;;  %v1071_v24 = vcombine.high %v1067_v16, %v1067_v16  ;;  %v1116_v25 = vmul.f32 %v1739_v7, %v1091_v18  ;;  %v1099_v27 = vrot.slane %v1069_v19, %v2553_v9 }
 0x1cf   : > { %1124 = vadd.xlane.f32.xlu1 %v1114_v13  ;;  %v1115_v21 = vmul.f32 %v1736_v14, %v1087_v15 }
 0x1d0   : > { %v1117_v28 = vmul.f32 %v1740_v22, %v1095_v23  ;;  %v1103_v30 = vrot.slane %v1071_v24, %v2553_v9  ;;  %v1118_v31 = vmul.f32 %v1743_v26, %v1099_v27 }
 0x1d1   : > { %1122 = vadd.xlane.f32.xlu0 %v1113_v17 }
 0x1d2   : > { %v1119_v32 = vmul.f32 %v1744_v29, %v1103_v30 }
 0x1d3   : > { %1126 = vadd.xlane.f32.xlu1 %v1115_v21 }
 0x1d5   : > { %1128 = vadd.xlane.f32.xlu0 %v1116_v25 }
 0x1d7   : > { %1130 = vadd.xlane.f32.xlu1 %v1117_v28 }
 0x1d9   : > { %1132 = vadd.xlane.f32.xlu0 %v1118_v31 }
 0x1db   : > { %1134 = vadd.xlane.f32.xlu1 %v1119_v32 }
 0x256   : > { %v1121_v33 = vpop.xlane.xlu0 %1120 }
 0x257   : > { %v1136_v34 = vmul.f32 %v1731_v59, %v1121_v33 }
 0x258   : > { %v1125_v35 = vpop.xlane.xlu1 %1124 }
 0x259   : > { %v1144_v36 = vrot.slane %v1136_v34, 4  ;;  %v1138_v37 = vmul.f32 %v1735_v0, %v1125_v35 }
 0x25a   : > { %v1123_v38 = vpop.xlane.xlu0 %1122 }
 0x25b   : > { %v1145_v39 = vadd.f32 %v1144_v36, %v1136_v34  ;;  %v1156_v40 = vrot.slane %v1138_v37, 4  ;;  %v1137_v41 = vmul.f32 %v1732_v3, %v1123_v38 }
 0x25c   : > { %v1127_v42 = vpop.xlane.xlu1 %1126 }
 0x25d   : > { %v1146_v43 = vrot.slane %v1145_v39, 2  ;;  %v1157_v44 = vadd.f32 %v1156_v40, %v1138_v37  ;;  %v1150_v45 = vrot.slane %v1137_v41, 4  ;;  %v1139_v46 = vmul.f32 %v1736_v14, %v1127_v42 }
 0x25e   : > { %v1129_v9 = vpop.xlane.xlu0 %1128 }
 0x25f   : > { %v1147_v47 = vadd.f32 %v1146_v43, %v1145_v39  ;;  %v1158_v48 = vrot.slane %v1157_v44, 2  ;;  %v1151_v49 = vadd.f32 %v1150_v45, %v1137_v41  ;;  %v1162_v50 = vrot.slane %v1139_v46, 4 }
 0x260   : > { %v1140_v51 = vmul.f32 %v1739_v7, %v1129_v9  ;;  %v1131_v52 = vpop.xlane.xlu1 %1130 }
 0x261   : > { %v1159_v53 = vadd.f32 %v1158_v48, %v1157_v44  ;;  %v1152_v54 = vrot.slane %v1151_v49, 2  ;;  %v1163_v55 = vadd.f32 %v1162_v50, %v1139_v46  ;;  %v1141_v57 = vmul.f32 %v1740_v22, %v1131_v52 }
 0x262   : > { %v1168_v56 = vrot.slane %v1140_v51, 4  ;;  %v1133_v58 = vpop.xlane.xlu0 %1132  ;;  %v1148_v59 = vrot.slane %v1147_v47, 1 }
 0x263   : > { %v1153_v60 = vadd.f32 %v1152_v54, %v1151_v49  ;;  %v1164_v61 = vrot.slane %v1163_v55, 2  ;;  %v1160_v62 = vrot.slane %v1159_v53, 1  ;;  %v1174_v0 = vrot.slane %v1141_v57, 4 }
 0x264   : > { %v1169_v63 = vadd.f32 %v1168_v56, %v1140_v51  ;;  %v1142_v1 = vmul.f32 %v1743_v26, %v1133_v58  ;;  %v1135_v2 = vpop.xlane.xlu1 %1134  ;;  %v1149_v11 = vadd.f32 %v1148_v59, %v1147_v47 }
 0x265   : > { %v1154_v3 = vrot.slane %v1153_v60, 1  ;;  %v1165_v4 = vadd.f32 %v1164_v61, %v1163_v55  ;;  %v1143_v5 = vmul.f32 %v1744_v29, %v1135_v2  ;;  %v1175_v8 = vadd.f32 %v1174_v0, %v1141_v57 }
 0x266   : > { %v1170_v6 = vrot.slane %v1169_v63, 2  ;;  %v1180_v10 = vrot.slane %v1142_v1, 4  ;;  %v1161_v15 = vadd.f32 %v1160_v62, %v1159_v53 }
 0x267   : > { %v1155_v12 = vadd.f32 %v1154_v3, %v1153_v60  ;;  %v1166_v13 = vrot.slane %v1165_v4, 1  ;;  %v1186_v14 = vrot.slane %v1143_v5, 4  ;;  %v1176_v17 = vrot.slane %v1175_v8, 2 }
 0x268   : > { %v1171_v16 = vadd.f32 %v1170_v6, %v1169_v63  ;;  %v1181_v7 = vadd.f32 %v1180_v10, %v1142_v1 }
 0x269   : > { %v1201_v18 = vsel %vm1200_vm1, %v1155_v12, %v1149_v11  ;;  %v1167_v19 = vadd.f32 %v1166_v13, %v1165_v4  ;;  %v1187_v20 = vadd.f32 %v1186_v14, %v1143_v5  ;;  %v1177_v23 = vadd.f32 %v1176_v17, %v1175_v8 }
 0x26a   : > { %v1203_v21 = vsel %vm1202_vm2, %v1161_v15, %v1201_v18  ;;  %v1172_v22 = vrot.slane %v1171_v16, 1  ;;  %v1182_v24 = vrot.slane %v1181_v7, 2 }
 0x26b   : > { %v1205_v25 = vsel %vm1204_vm3, %v1167_v19, %v1203_v21  ;;  %v1188_v26 = vrot.slane %v1187_v20, 2  ;;  %v1178_v28 = vrot.slane %v1177_v23, 1 }
 0x26c   : > { %v1173_v27 = vadd.f32 %v1172_v22, %v1171_v16  ;;  %v1183_v29 = vadd.f32 %v1182_v24, %v1181_v7 }
 0x26d   : > { %v1189_v30 = vadd.f32 %v1188_v26, %v1187_v20  ;;  %v1179_v32 = vadd.f32 %v1178_v28, %v1177_v23 }
 0x26e   : > { %v1207_v31 = vsel %vm1206_vm4, %v1173_v27, %v1205_v25  ;;  %v1184_v33 = vrot.slane %v1183_v29, 1 }
 0x26f   : > { %v1190_v34 = vrot.slane %v1189_v30, 1  ;;  %v1209_v35 = vsel %vm1208_vm5, %v1179_v32, %v1207_v31 }
 0x270   : > { %v1185_v36 = vadd.f32 %v1184_v33, %v1183_v29 }
 0x271   : > { %v1191_v37 = vadd.f32 %v1190_v34, %v1189_v30 }
 0x272   : > { %v1211_v38 = vsel %vm1210_vm6, %v1185_v36, %v1209_v35 }
 0x273   : > { %v1213_v39 = vsel %vm1212_vm7, %v1191_v37, %v1211_v38 }
 0x274   : > { %1215 = vst [vmem:[#allocation4] sm:$0xff] %v1213_v39 }
 0x275 PF: > { %v1959_v40 = vld [vmem:[#allocation19 + $0x38] sm:$0xff]   ;;  %v2330_v41 = vmov 0.0   ;;  %v1961_v43 = vld [vmem:[#allocation19 + $0x30] sm:$0xff]   ;;  %vm2331_vm8 = vmmov 0   ;;  %v1963_v45 = vld [vmem:[#allocation19 + $0x28] sm:$0xff]   ;;  %p1716_p9 = scmp.ne.s32.totalorder %s2305_s21, 0 }
 0x276   : > { %1766 = vmatprep.subr.bf16.mxu0 %v2330_v41  ;;  %1786 = vmatprep.subr.bf16.mxu1 %v2330_v41  ;;  %v1960_v42 = vld [vmem:[#allocation18 + $0x38] sm:$0xff]   ;;  %v1962_v44 = vld [vmem:[#allocation18 + $0x30] sm:$0xff]   ;;  %v1964_v46 = vld [vmem:[#allocation18 + $0x28] sm:$0xff]  }
 0x277   : > { %1767 = vmatpush3.bf16.msra.mxu0 %v1959_v40  ;;  %1782 = vmatprep.mubr.msk.bf16.mxu0 %vm2331_vm8, %v2330_v41  ;;  %v1965_v9 = vld [vmem:[#allocation19 + $0x20] sm:$0xff]   ;;  %v1967_v48 = vld [vmem:[#allocation19 + $0x18] sm:$0xff]   ;;  %v1969_v50 = vld [vmem:[#allocation19 + $0x10] sm:$0xff]  }
 0x278   : > { %1787 = vmatpush3.bf16.msra.mxu1 %v1960_v42  ;;  %1768 = vmatprep.subr.bf16.mxu0 %v2330_v41  ;;  %v1966_v47 = vld [vmem:[#allocation18 + $0x20] sm:$0xff]   ;;  %v1968_v49 = vld [vmem:[#allocation18 + $0x18] sm:$0xff]   ;;  %v1970_v51 = vld [vmem:[#allocation18 + $0x10] sm:$0xff]  }
 0x279   : > { %1788 = vmatprep.subr.bf16.mxu1 %v2330_v41  ;;  %1802 = vmatprep.mubr.msk.bf16.mxu1 %vm2331_vm8, %v2330_v41  ;;  %v1971_v52 = vld [vmem:[#allocation19 + $0x8] sm:$0xff]   ;;  %v1973_v54 = vld [vmem:[#allocation19] sm:$0xff]  }
 0x27a   : > { %v1972_v53 = vld [vmem:[#allocation18 + $0x8] sm:$0xff]   ;;  %v1974_v56 = vld [vmem:[#allocation18] sm:$0xff]  }
 0x27b   : > { %1769 = vmatpush3.bf16.msra.mxu0 %v1961_v43  ;;  %v1221_v55 = vld [vmem:[#allocation4] sm:$0xff]  ;;  %v1219_v57 = vld [vmem:[#allocation2] sm:$0xff] }
 0x27c   : > { %1789 = vmatpush3.bf16.msra.mxu1 %v1962_v44  ;;  %1770 = vmatprep.subr.bf16.mxu0 %v2330_v41  ;;  %v1222_v58 = vpack.c.bf16 %v1221_v55, %v1221_v55  ;;  %v1220_v59 = vpack.c.bf16 %v1219_v57, %v1219_v57  ;;  %v1715_v62 = vld [vmem:[%s2633_s9] ss:$0 sm:$0xff] }
 0x27d   : > { %1790 = vmatprep.subr.bf16.mxu1 %v2330_v41 }
 0x27f   : > { %1771 = vmatpush3.bf16.msra.mxu0 %v1963_v45 }
 0x280   : > { %1791 = vmatpush3.bf16.msra.mxu1 %v1964_v46  ;;  %1772 = vmatprep.subr.bf16.mxu0 %v2330_v41 }
 0x281   : > { %1792 = vmatprep.subr.bf16.mxu1 %v2330_v41 }
 0x283   : > { %1773 = vmatpush3.bf16.msra.mxu0 %v1965_v9 }
 0x284   : > { %1793 = vmatpush3.bf16.msra.mxu1 %v1966_v47  ;;  %1774 = vmatprep.subr.bf16.mxu0 %v2330_v41 }
 0x285   : > { %1794 = vmatprep.subr.bf16.mxu1 %v2330_v41 }
 0x287   : > { %1775 = vmatpush3.bf16.msra.mxu0 %v1967_v48 }
 0x288   : > { %1795 = vmatpush3.bf16.msra.mxu1 %v1968_v49  ;;  %1776 = vmatprep.subr.bf16.mxu0 %v2330_v41 }
 0x289   : > { %1796 = vmatprep.subr.bf16.mxu1 %v2330_v41 }
 0x28b   : > { %1777 = vmatpush3.bf16.msra.mxu0 %v1969_v50 }
 0x28c   : > { %1797 = vmatpush3.bf16.msra.mxu1 %v1970_v51  ;;  %1778 = vmatprep.subr.bf16.mxu0 %v2330_v41 }
 0x28d   : > { %1798 = vmatprep.subr.bf16.mxu1 %v2330_v41 }
 0x28f   : > { %1779 = vmatpush3.bf16.msra.mxu0 %v1971_v52 }
 0x290   : > { %1799 = vmatpush3.bf16.msra.mxu1 %v1972_v53  ;;  %1780 = vmatprep.subr.bf16.mxu0 %v2330_v41 }
 0x291   : > { %1800 = vmatprep.subr.bf16.mxu1 %v2330_v41 }
 0x293   : > { %1781 = vmatpush3.bf16.msra.mxu0 %v1973_v54 }
 0x294   : > { %1801 = vmatpush3.bf16.msra.mxu1 %v1974_v56 }
 0x296   : > { %1783 = vmatmul.mubr.bf16.vlgmr.msra.gmra.mxu0 %v1222_v58 }
 0x297   : > { %1803 = vmatmul.mubr.bf16.vlgmr.msra.gmra.mxu1 %v1220_v59 }
 0x356   : > { %v1337_v60 = vpop.f32.mrf.mxu0 }
 0x357   : > { %v1425_v61 = vpop.f32.mrf.mxu1 }
 0x358   : > { %v1426_v63 = vadd.f32 %v1425_v61, %v1337_v60  ;;  %v1784_v0 = vpop.f32.mrf.mxu0 }
 0x359   : > { %v1804_v1 = vpop.f32.mrf.mxu1  ;;  %1441 = sbr.rel (%p1716_p9) target bundleno = 1285 (0x505), region = 100 }
 0x35a   : > { %v1438_v2 = vadd.f32 %v1715_v62, %v1426_v63  ;;  %v1340_v3 = vpop.f32.mrf.mxu0 }
 0x35b   : > { %v1428_v4 = vpop.f32.mrf.mxu1 }
 0x35c   : > { %v1785_v5 = vpop.f32.mrf.mxu0 }
 0x35d   : > { %v1805_v6 = vpop.f32.mrf.mxu1 }
 0x35e   : > { %1443 = vmax.xlane.f32.xlu0 %v1438_v2  ;;  %1465 = vst [vmem:[#allocation21] sm:$0xff] %v1438_v2  ;;  %v2332_v8 = vmov 0   ;;  %v1442_v10 = vld [vmem:[#allocation5] sm:$0xff]  ;;  %vm1462_vm9 = vcmask 7168   ;;  %v1446_v19 = vld [vmem:[#allocation6] sm:$0xff] }
 0x35f   : > { %1975 = vset.pattern.permute.xlu0 %v2332_v8 }
 0x3e7   : > { %v1444_v11 = vpop.xlane.xlu0 %1443 }
 0x3e8   : > { %v1445_v12 = vmax.f32 %v1442_v10, %v1444_v11 }
 0x3ea   : > { %v1447_v13 = vsub.f32 %v1442_v10, %v1445_v12  ;;  %1464 = vst.msk [vmem:[#allocation5] sm:$0xff] %vm1462_vm9, %v1445_v12  ;;  %1453 = vperm.xlu0 %1975, %v1445_v12  }
 0x3ec   : > { %v1448_v7 = vmul.f32 1.442695, %v1447_v13 }
 0x465   : > { %v1454_v14 = vpop.permute.xlu0 %1453 }
 0x466   : > { %v1456_v15 = vsub.f32 %v1438_v2, %v1454_v14 }
 0x468   : > { %v1457_v16 = vmul.f32 1.442695, %v1456_v15 }
 0x46a   : > { %1976 = vpow2.f32 %v1457_v16 }
 0x46b   : > { %1978 = vpow2.f32 %v1448_v7 }
 0x477   : > { %v1977_v17 = vpop.eup %1976 }
 0x478   : > { %1459 = vadd.xlane.f32.xlu1 %v1977_v17  ;;  %v1979_v18 = vpop.eup %1978 }
 0x479   : > { %v1450_v20 = vmul.f32 %v1979_v18, %v1446_v19 }
 0x501   : > { %v1460_v21 = vpop.xlane.xlu1 %1459 }
 0x502   : > { %v1461_v22 = vadd.f32 %v1460_v21, %v1450_v20 }
 0x504   : > { %1463 = vst.msk [vmem:[#allocation6] sm:$0xff] %vm1462_vm9, %v1461_v22 }
 0x505 PF: > { %p1466_p10 = scmp.eq.s32.totalorder %s2305_s21, 1  ;;  %p1717_p11 = scmp.ne.s32.totalorder %s2305_s21, 1 }
 0x507   : > { %1469 = sbr.rel (%p1717_p11) target bundleno = 1438 (0x59e), region = 104 }
 0x50c   : > { %v1471_v23 = vld [vmem:[#allocation6] sm:$0xff]  ;;  %v2333_v24 = vmov 0   ;;  %v1470_v26 = vld [vmem:[#allocation5] sm:$0xff] }
 0x50d   : > { %1980 = vset.pattern.permute.xlu0 %v2333_v24  ;;  %1981 = vlog2.f32 %v1471_v23 }
 0x51a   : > { %v1982_v25 = vpop.eup %1981 }
 0x51b   : > { %v1473_v27 = vmul.f32 0.6931472, %v1982_v25 }
 0x51d   : > { %v1474_v28 = vadd.f32 %v1473_v27, %v1470_v26 }
 0x51f   : > { %1477 = vperm.xlu0 %1980, %v1474_v28  }
 0x59a   : > { %v1478_v29 = vpop.permute.xlu0 %1477 }
 0x59b   : > { %v1480_v30 = vsub.f32 %v1438_v2, %v1478_v29 }
 0x59d   : > { %1481 = vst [vmem:[#allocation21] sm:$0xff] %v1480_v30 }
 0x59e PF: > { %1485 = sbr.rel (!%p1466_p10) target bundleno = 1443 (0x5a3), region = 108  ;;  %v1486_v31 = vld [vmem:[#allocation2] sm:$0xff] (%p1466_p10)  ;;  %v1488_v32 = vld [vmem:[#allocation3] sm:$0xff] (%p1466_p10) }
 0x59f   : > { %1487 = vst [vmem:[#allocation22] sm:$0xff] (%p1466_p10), %v1486_v31  ;;  %1489 = vst [vmem:[#allocation24] sm:$0xff] (%p1466_p10), %v1488_v32 }
 0x5a3 PF: > { %s2657_s20 = sadd.s32 4294967295, %s2313_s23   ;;  %s2334_s26 = smov [#allocation22]  }
 0x5a4   : > { %p2582_p12 = scmp.eq.s32.totalorder %s2657_s20, 1  ;;  %s1510_s15 = sshll.u32 %s2334_s26, 4  ;;  %s1511_s15 = int_to_ptr.vmem [resolvable:$true] %s1510_s15 }
 0x5a5   : > { %s2191_s17 = scalar_lea.vmem %s1511_s15, 128  ;;  %p2198_p4 = scmp.lt.s32.totalorder %s1511_s15, %s1511_s15 }
 0x5a6   : > { %p2192_p13 = scmp.ne.s32.totalorder %s1511_s15, %s2191_s17  ;;  %p2199_p7 = scmp.lt.s32.totalorder %s2191_s17, %s2191_s17 }
 0x5a8   : > { %p2193_p0 = pnand %p2192_p13, %p2582_p12  ;;  %p2200_p8 = por %p2199_p7, %p2198_p4 }
 0x5aa   : > { %p2194_p1 = pneg %p2193_p0 }
 0x5ac   : > { %p2201_p2 = pnand %p2200_p8, %p2194_p1 }
 0x5ae   : > { %2204 = shalt.err (!%p2201_p2)
}
 0x5af   : > { %1841 = dma.vmem_to_hbm [thread:$0]  (%p2582_p12), %s1511_s15, 128, %s2635_s11, [#allocation23]  }
 0x5b0   : > { %s2335_s29 = smov [#allocation21]   ;;  %s2336_s24 = smov [#allocation24]  }
 0x5b1   : > { %s1499_s19 = sshll.u32 %s2335_s29, 4  ;;  %s1521_s0 = sshll.u32 %s2336_s24, 4  ;;  %s1500_s19 = int_to_ptr.vmem [resolvable:$true] %s1499_s19  ;;  %s1522_s0 = int_to_ptr.vmem [resolvable:$true] %s1521_s0 }
 0x5b2   : > { %s2215_s30 = scalar_lea.vmem %s1500_s19, 128  ;;  %p2222_p9 = scmp.lt.s32.totalorder %s1500_s19, %s1500_s19 }
 0x5b3   : > { %p2216_p3 = scmp.ne.s32.totalorder %s1500_s19, %s2215_s30  ;;  %p2223_p10 = scmp.lt.s32.totalorder %s2215_s30, %s2215_s30 }
 0x5b5   : > { %p2217_p6 = pnand %p2216_p3, %p2582_p12  ;;  %p2224_p11 = por %p2223_p10, %p2222_p9 }
 0x5b7   : > { %p2218_p5 = pneg %p2217_p6 }
 0x5b9   : > { %p2225_p13 = pnand %p2224_p11, %p2218_p5 }
 0x5bb   : > { %2228 = shalt.err (!%p2225_p13)
}
 0x5bc   : > { %1839 = dma.vmem_to_hbm [thread:$0]  (%p2582_p12), %s1500_s19, 128, %s2634_s10, [#allocation9]  }
 0x5bd   : > { %s2239_s13 = scalar_lea.vmem %s1522_s0, 128  ;;  %p2246_p7 = scmp.lt.s32.totalorder %s1522_s0, %s1522_s0 }
 0x5be   : > { %p2240_p0 = scmp.ne.s32.totalorder %s1522_s0, %s2239_s13  ;;  %p2247_p8 = scmp.lt.s32.totalorder %s2239_s13, %s2239_s13 }
 0x5c0   : > { %p2241_p1 = pnand %p2240_p0, %p2582_p12  ;;  %p2248_p2 = por %p2247_p8, %p2246_p7 }
 0x5c2   : > { %p2242_p4 = pneg %p2241_p1 }
 0x5c4   : > { %p2249_p3 = pnand %p2248_p2, %p2242_p4 }
 0x5c6   : > { %2252 = shalt.err (!%p2249_p3)
}
 0x5c7   : > { %1843 = dma.vmem_to_hbm [thread:$0]  (%p2582_p12), %s1522_s0, 128, %s2636_s12, [#allocation23]  }
 0x5c8   : > { %2296 = dma.done.wait (%p2582_p12), [#allocation9], 128  }
 0x5c9   : > { %2298 = vsyncadd (%p2582_p12), [#allocation9], 4294967168 }
 0x5ca   : > { %2300 = dma.done.wait (%p2582_p12), [#allocation23], 256  }
 0x5cb   : > { %2302 = vsyncadd (%p2582_p12), [#allocation23], 4294967040 }
 0x5cc PF: > { %s30_s23 = sadd.s32 1, %s2313_s23   ;;  %s2659_s21 = smov %s2309_s22 }
 0x5cd   : > { %p27_p6 = scmp.ge.s32.totalorder %s30_s23, 4   ;;  %s2660_s22 = smov %s2662_s25 }
 0x5cf   :  { %29 = sbr.rel (!%p27_p6) target bundleno = 10 (0xa), region = 155 }
 0x5d4   :  { %1542 = vsyncpa [#allocation8], 1 }
 0x5d5   :  { %1544 = vsyncpa [#allocation8 + $0x1], 1 }
 0x5d6   :  { %1545 = vsyncpa [#allocation11], 1 }
 0x5d7   :  { %1546 = vsyncpa [#allocation14], 1 }
 0x5d8   :  { %1547 = vsyncpa [#allocation17], 1 }
 0x5d9   :  { %1548 = vsyncpa [#allocation20], 1 }
 0x5da   :  { %1549 = vsyncpa [#allocation9], 1 }
 0x5db   :  { %1551 = vsyncpa [#allocation9 + $0x1], 1 }
 0x5dc   :  { %1552 = vsyncpa [#allocation23], 1 }

</bundles_post_ra>
